<compile_context>
chip_gen: v7x
topology: tpu7x:2x2x1
jax: 0.10.0
libtpu: 0.0.40
codegen_flags: <defaults>
</compile_context>

<pallas_src>
import functools

import jax
import jax.numpy as jnp
from jax.experimental import pallas as pl
from jax.experimental.pallas import tpu as pltpu


def _sigmoid(v):
    # Explicit exp-based sigmoid (EUP exp + f32 divide); guaranteed Mosaic lowering.
    return 1.0 / (1.0 + jnp.exp(-v))


def _binary_gru_kernel(x_ref, wih_ref, whh_ref, bi_ref, bhn_ref, h_ref, *, batch):
    """Whole-sequence Binary GRU.

    Layouts prepared by the wrapper (gate order r, z, n; gate g occupies lanes
    [g*HP, g*HP + H) of the fused 3*HP axis, the rest is zero padding):
      x_ref   : (T*B, IN)   f32   time-major rows (row = t*B + b)
      wih_ref : (IN, 3*HP)  f32   W_i{r,z,n}^T packed + lane-padded
      whh_ref : (HP, 3*HP)  bf16  W_h{r,z,n}^T packed + row/lane zero-padded
      bi_ref  : (1, 3*HP)   f32   (b_ir+b_hr | b_iz+b_hz | b_in)
      bhn_ref : (1, HP)     f32   b_hn (kept separate: r scales (W_hn h + b_hn))
      h_ref   : (B, H)      f32   output = binarized final hidden state
    """
    TB, _ = x_ref.shape
    T = TB // batch
    HP3 = wih_ref.shape[1]
    HP = HP3 // 3
    H = h_ref.shape[-1]

    # ---- Hoisted, fused input projection (off the serial critical path) ----
    gi = (jnp.dot(x_ref[...], wih_ref[...], preferred_element_type=jnp.float32)
          + bi_ref[...])                                   # (T*B, 3*HP)

    whh = whh_ref[...]                                     # (HP, 3*HP) bf16, loop-resident
    bhn = bhn_ref[...]                                     # (1, HP)

    def gates(v):
        # Gate columns sit at 128-lane-aligned offsets -> clean vreg slices.
        return v[:, 0:HP], v[:, HP:2 * HP], v[:, 2 * HP:3 * HP]

    # ---- Peeled first step: h == 0, so the recurrent matmul vanishes -------
    gi_r, gi_z, gi_n = gates(gi[0:batch])
    r = _sigmoid(gi_r)
    z = _sigmoid(gi_z)
    n = jnp.tanh(gi_n + r * bhn)
    # Binary activation quantizer: sign(x) with sign(0) -> +1.
    # TODO(synk): swap in the exact injected activation_quantizer if it differs
    # (e.g. torch.sign's sign(0)=0, or an STE/threshold variant).
    h = jnp.where((1.0 - z) * n >= 0.0, 1.0, -1.0)         # (B, HP); padded lanes are inert

    # ---- Remaining steps: ONE fused bf16 (B,HP)@(HP,3*HP) matmul per step ---
    for t in range(1, T):                                  # static, fully unrolled
        gh = jnp.dot(h.astype(jnp.bfloat16), whh,          # h in {-1,+1}: lossless bf16 cast
                     preferred_element_type=jnp.float32)   # (B, 3*HP)
        gh_r, gh_z, gh_n = gates(gh)
        gi_r, gi_z, gi_n = gates(gi[t * batch:(t + 1) * batch])
        r = _sigmoid(gi_r + gh_r)
        z = _sigmoid(gi_z + gh_z)
        n = jnp.tanh(gi_n + r * (gh_n + bhn))
        h_new = (1.0 - z) * n + z * h                      # torch.nn.GRUCell update
        h = jnp.where(h_new >= 0.0, 1.0, -1.0)             # binary activation quantizer

    h_ref[...] = h[:, :H].astype(h_ref.dtype)              # single store at the end


def binary_gru_cell(x, w_ih, w_hh, b_ih, b_hh, time_steps):
    """Pallas implementation of BinaryGRUCell.forward.

    Args:
      x:     (B, T, IN) float input (PyTorch `input`, indexed input[:, t]).
      w_ih:  (3H, IN)   GRUCell weight_ih (gate order r, z, n).
      w_hh:  (3H, H)    GRUCell weight_hh.
      b_ih:  (3H,)      GRUCell bias_ih.
      b_hh:  (3H,)      GRUCell bias_hh.
      time_steps: static Python int, 1 <= time_steps <= T.

    Returns:
      final_hidden: (B, H) float32, binarized to {-1, +1}.
    """
    B, T, IN = x.shape
    H = w_hh.shape[1]
    assert w_ih.shape == (3 * H, IN)
    assert w_hh.shape == (3 * H, H)
    assert b_ih.shape == (3 * H,)
    assert b_hh.shape == (3 * H,)
    assert 1 <= time_steps <= T

    # Pad each gate's output width to a 128-lane boundary so in-kernel gate
    # extraction lands on vreg boundaries.
    HP = ((H + 127) // 128) * 128

    # Time-major rows (row = t*B + b): per-step reads become leading-axis slices.
    x_tm = jnp.transpose(x[:, :time_steps].astype(jnp.float32), (1, 0, 2))
    x_tm = x_tm.reshape(time_steps * B, IN)

    # Gate-separated, transposed weights packed into fused, lane-padded matrices.
    w_ih_g = jnp.transpose(w_ih.reshape(3, H, IN).astype(jnp.float32), (0, 2, 1))  # (3, IN, H)
    w_hh_g = jnp.transpose(w_hh.reshape(3, H, H).astype(jnp.float32), (0, 2, 1))   # (3, H, H)
    b_ih_g = b_ih.reshape(3, H).astype(jnp.float32)
    b_hh_g = b_hh.reshape(3, H).astype(jnp.float32)

    wih_cat = jnp.zeros((IN, 3 * HP), jnp.float32)
    whh_cat = jnp.zeros((HP, 3 * HP), jnp.float32)
    bi_cat = jnp.zeros((1, 3 * HP), jnp.float32)
    for g in range(3):
        wih_cat = wih_cat.at[:, g * HP:g * HP + H].set(w_ih_g[g])
        whh_cat = whh_cat.at[:H, g * HP:g * HP + H].set(w_hh_g[g])
    # Fold b_ih + b_hh for r and z; keep b_hn separate (r scales (W_hn h + b_hn)).
    bi_cat = bi_cat.at[0, 0 * HP:0 * HP + H].set(b_ih_g[0] + b_hh_g[0])
    bi_cat = bi_cat.at[0, 1 * HP:1 * HP + H].set(b_ih_g[1] + b_hh_g[1])
    bi_cat = bi_cat.at[0, 2 * HP:2 * HP + H].set(b_ih_g[2])
    bhn_pad = jnp.zeros((1, HP), jnp.float32).at[0, :H].set(b_hh_g[2])

    # bf16 recurrent weights: one MXU pass per step (f32 dots decompose into
    # multiple bf16 passes). Input projection stays f32 (off the critical path).
    whh_cat = whh_cat.astype(jnp.bfloat16)

    # Gridless: total VMEM footprint is ~150 KB, so every operand is a whole-array
    # VMEM block and the serial time loop lives inside the kernel.
    # TODO(synk): at production batch sizes add a batch-tiled "parallel" grid axis
    # (uses both v7x TensorCores and bounds VMEM if B*T*H grows).
    return pl.pallas_call(
        functools.partial(_binary_gru_kernel, batch=B),
        out_shape=jax.ShapeDtypeStruct((B, H), jnp.float32),
        in_specs=[pl.BlockSpec(memory_space=pltpu.MemorySpace.VMEM)] * 5,
        out_specs=pl.BlockSpec(memory_space=pltpu.MemorySpace.VMEM),
    )(x_tm, wih_cat, whh_cat, bi_cat, bhn_pad)


if __name__ == "__main__":
    # Small shapes consistent with the module's forward.
    B, T = 2, 8
    RNN_IN_BITS, RNN_HIDDEN_BITS = 16, 32

    key = jax.random.PRNGKey(0)
    kx, k1, k2, k3, k4 = jax.random.split(key, 5)

    # Deterministic parameter init mimicking nn.GRUCell: U(-1/sqrt(H), 1/sqrt(H)).
    bound = 1.0 / jnp.sqrt(jnp.float32(RNN_HIDDEN_BITS))
    w_ih = jax.random.uniform(k1, (3 * RNN_HIDDEN_BITS, RNN_IN_BITS),
                              minval=-bound, maxval=bound, dtype=jnp.float32)
    w_hh = jax.random.uniform(k2, (3 * RNN_HIDDEN_BITS, RNN_HIDDEN_BITS),
                              minval=-bound, maxval=bound, dtype=jnp.float32)
    b_ih = jax.random.uniform(k3, (3 * RNN_HIDDEN_BITS,),
                              minval=-bound, maxval=bound, dtype=jnp.float32)
    b_hh = jax.random.uniform(k4, (3 * RNN_HIDDEN_BITS,),
                              minval=-bound, maxval=bound, dtype=jnp.float32)

    x = jax.random.normal(kx, (B, T, RNN_IN_BITS), dtype=jnp.float32)

    final_hidden = binary_gru_cell(x, w_ih, w_hh, b_ih, b_hh, time_steps=T)
    final_hidden = jax.block_until_ready(final_hidden)

    assert final_hidden.shape == (B, RNN_HIDDEN_BITS)
    assert final_hidden.dtype == jnp.float32
    # Output must be fully binarized to {-1, +1}.
    assert bool(jnp.all(jnp.abs(final_hidden) == 1.0))
    print("KERNEL_OK")
</pallas_src>

<mosaic_0001>
module attributes {stable_mosaic.version = 11 : i64} {
  func.func @_binary_gru_kernel(%arg0: memref<16x16xf32, #tpu.memory_space<vmem>>, %arg1: memref<16x384xf32, #tpu.memory_space<vmem>>, %arg2: memref<128x384xbf16, #tpu.memory_space<vmem>>, %arg3: memref<1x384xf32, #tpu.memory_space<vmem>>, %arg4: memref<1x128xf32, #tpu.memory_space<vmem>>, %arg5: memref<2x32xf32, #tpu.memory_space<vmem>>) attributes {dimension_semantics = [], scalar_prefetch = 0 : i64, scratch_operands = 0 : i64, tpu.core_type = #tpu.core_type<tc>} {
    %c0 = arith.constant 0 : index
    %c0_0 = arith.constant 0 : index
    %0 = vector.load %arg0[%c0, %c0_0] : memref<16x16xf32, #tpu.memory_space<vmem>>, vector<16x16xf32>
    %c0_1 = arith.constant 0 : index
    %c0_2 = arith.constant 0 : index
    %1 = vector.load %arg1[%c0_1, %c0_2] : memref<16x384xf32, #tpu.memory_space<vmem>>, vector<16x384xf32>
    %cst = arith.constant dense<0.000000e+00> : vector<16x384xf32>
    %2 = tpu.matmul %0, %1, %cst {dimension_numbers = #tpu.dot_dimension_numbers<[1], [0], [0], [1], [0, 0, 1, 1], [], []>} : vector<16x16xf32>, vector<16x384xf32>, vector<16x384xf32> -> vector<16x384xf32>
    %c0_3 = arith.constant 0 : index
    %c0_4 = arith.constant 0 : index
    %3 = vector.load %arg3[%c0_3, %c0_4] : memref<1x384xf32, #tpu.memory_space<vmem>>, vector<1x384xf32>
    %4 = vector.broadcast %3 : vector<1x384xf32> to vector<16x384xf32>
    %5 = arith.addf %2, %4 : vector<16x384xf32>
    %c0_5 = arith.constant 0 : index
    %c0_6 = arith.constant 0 : index
    %6 = vector.load %arg2[%c0_5, %c0_6] : memref<128x384xbf16, #tpu.memory_space<vmem>>, vector<128x384xbf16>
    %c0_7 = arith.constant 0 : index
    %c0_8 = arith.constant 0 : index
    %7 = vector.load %arg4[%c0_7, %c0_8] : memref<1x128xf32, #tpu.memory_space<vmem>>, vector<1x128xf32>
    %8 = vector.extract_strided_slice %5 {offsets = [0, 0], sizes = [2, 384], strides = [1, 1]} : vector<16x384xf32> to vector<2x384xf32>
    %9 = vector.extract_strided_slice %8 {offsets = [0, 0], sizes = [2, 128], strides = [1, 1]} : vector<2x384xf32> to vector<2x128xf32>
    %10 = vector.extract_strided_slice %8 {offsets = [0, 128], sizes = [2, 128], strides = [1, 1]} : vector<2x384xf32> to vector<2x128xf32>
    %11 = vector.extract_strided_slice %8 {offsets = [0, 256], sizes = [2, 128], strides = [1, 1]} : vector<2x384xf32> to vector<2x128xf32>
    %cst_9 = arith.constant 0.000000e+00 : f32
    %12 = vector.broadcast %cst_9 : f32 to vector<2x128xf32>
    %13 = arith.subf %12, %9 : vector<2x128xf32>
    %14 = math.exp %13 : vector<2x128xf32>
    %cst_10 = arith.constant 1.000000e+00 : f32
    %15 = vector.broadcast %cst_10 : f32 to vector<2x128xf32>
    %16 = arith.addf %15, %14 : vector<2x128xf32>
    %cst_11 = arith.constant 1.000000e+00 : f32
    %17 = vector.broadcast %cst_11 : f32 to vector<2x128xf32>
    %18 = arith.divf %17, %16 : vector<2x128xf32>
    %cst_12 = arith.constant 0.000000e+00 : f32
    %19 = vector.broadcast %cst_12 : f32 to vector<2x128xf32>
    %20 = arith.subf %19, %10 : vector<2x128xf32>
    %21 = math.exp %20 : vector<2x128xf32>
    %cst_13 = arith.constant 1.000000e+00 : f32
    %22 = vector.broadcast %cst_13 : f32 to vector<2x128xf32>
    %23 = arith.addf %22, %21 : vector<2x128xf32>
    %cst_14 = arith.constant 1.000000e+00 : f32
    %24 = vector.broadcast %cst_14 : f32 to vector<2x128xf32>
    %25 = arith.divf %24, %23 : vector<2x128xf32>
    %26 = vector.broadcast %7 : vector<1x128xf32> to vector<2x128xf32>
    %27 = arith.mulf %18, %26 : vector<2x128xf32>
    %28 = arith.addf %11, %27 : vector<2x128xf32>
    %29 = math.tanh %28 : vector<2x128xf32>
    %cst_15 = arith.constant 1.000000e+00 : f32
    %30 = vector.broadcast %cst_15 : f32 to vector<2x128xf32>
    %31 = arith.subf %30, %25 : vector<2x128xf32>
    %32 = arith.mulf %31, %29 : vector<2x128xf32>
    %cst_16 = arith.constant 0.000000e+00 : f32
    %33 = vector.broadcast %cst_16 : f32 to vector<2x128xf32>
    %34 = arith.cmpf oge, %32, %33 : vector<2x128xf32>
    %cst_17 = arith.constant 1.000000e+00 : f32
    %cst_18 = arith.constant -1.000000e+00 : f32
    %35 = vector.broadcast %cst_17 : f32 to vector<2x128xf32>
    %36 = vector.broadcast %cst_18 : f32 to vector<2x128xf32>
    %37 = arith.select %34, %35, %36 : vector<2x128xi1>, vector<2x128xf32>
    %38 = arith.truncf %37 : vector<2x128xf32> to vector<2x128xbf16>
    %cst_19 = arith.constant dense<0.000000e+00> : vector<2x384xf32>
    %39 = tpu.matmul %38, %6, %cst_19 {dimension_numbers = #tpu.dot_dimension_numbers<[1], [0], [0], [1], [0, 0, 1, 1], [], []>} : vector<2x128xbf16>, vector<128x384xbf16>, vector<2x384xf32> -> vector<2x384xf32>
    %40 = vector.extract_strided_slice %39 {offsets = [0, 0], sizes = [2, 128], strides = [1, 1]} : vector<2x384xf32> to vector<2x128xf32>
    %41 = vector.extract_strided_slice %39 {offsets = [0, 128], sizes = [2, 128], strides = [1, 1]} : vector<2x384xf32> to vector<2x128xf32>
    %42 = vector.extract_strided_slice %39 {offsets = [0, 256], sizes = [2, 128], strides = [1, 1]} : vector<2x384xf32> to vector<2x128xf32>
    %43 = vector.extract_strided_slice %5 {offsets = [2, 0], sizes = [2, 384], strides = [1, 1]} : vector<16x384xf32> to vector<2x384xf32>
    %44 = vector.extract_strided_slice %43 {offsets = [0, 0], sizes = [2, 128], strides = [1, 1]} : vector<2x384xf32> to vector<2x128xf32>
    %45 = vector.extract_strided_slice %43 {offsets = [0, 128], sizes = [2, 128], strides = [1, 1]} : vector<2x384xf32> to vector<2x128xf32>
    %46 = vector.extract_strided_slice %43 {offsets = [0, 256], sizes = [2, 128], strides = [1, 1]} : vector<2x384xf32> to vector<2x128xf32>
    %47 = arith.addf %44, %40 : vector<2x128xf32>
    %cst_20 = arith.constant 0.000000e+00 : f32
    %48 = vector.broadcast %cst_20 : f32 to vector<2x128xf32>
    %49 = arith.subf %48, %47 : vector<2x128xf32>
    %50 = math.exp %49 : vector<2x128xf32>
    %cst_21 = arith.constant 1.000000e+00 : f32
    %51 = vector.broadcast %cst_21 : f32 to vector<2x128xf32>
    %52 = arith.addf %51, %50 : vector<2x128xf32>
    %cst_22 = arith.constant 1.000000e+00 : f32
    %53 = vector.broadcast %cst_22 : f32 to vector<2x128xf32>
    %54 = arith.divf %53, %52 : vector<2x128xf32>
    %55 = arith.addf %45, %41 : vector<2x128xf32>
    %cst_23 = arith.constant 0.000000e+00 : f32
    %56 = vector.broadcast %cst_23 : f32 to vector<2x128xf32>
    %57 = arith.subf %56, %55 : vector<2x128xf32>
    %58 = math.exp %57 : vector<2x128xf32>
    %cst_24 = arith.constant 1.000000e+00 : f32
    %59 = vector.broadcast %cst_24 : f32 to vector<2x128xf32>
    %60 = arith.addf %59, %58 : vector<2x128xf32>
    %cst_25 = arith.constant 1.000000e+00 : f32
    %61 = vector.broadcast %cst_25 : f32 to vector<2x128xf32>
    %62 = arith.divf %61, %60 : vector<2x128xf32>
    %63 = vector.broadcast %7 : vector<1x128xf32> to vector<2x128xf32>
    %64 = arith.addf %42, %63 : vector<2x128xf32>
    %65 = arith.mulf %54, %64 : vector<2x128xf32>
    %66 = arith.addf %46, %65 : vector<2x128xf32>
    %67 = math.tanh %66 : vector<2x128xf32>
    %cst_26 = arith.constant 1.000000e+00 : f32
    %68 = vector.broadcast %cst_26 : f32 to vector<2x128xf32>
    %69 = arith.subf %68, %62 : vector<2x128xf32>
    %70 = arith.mulf %69, %67 : vector<2x128xf32>
    %71 = arith.mulf %62, %37 : vector<2x128xf32>
    %72 = arith.addf %70, %71 : vector<2x128xf32>
    %cst_27 = arith.constant 0.000000e+00 : f32
    %73 = vector.broadcast %cst_27 : f32 to vector<2x128xf32>
    %74 = arith.cmpf oge, %72, %73 : vector<2x128xf32>
    %cst_28 = arith.constant 1.000000e+00 : f32
    %cst_29 = arith.constant -1.000000e+00 : f32
    %75 = vector.broadcast %cst_28 : f32 to vector<2x128xf32>
    %76 = vector.broadcast %cst_29 : f32 to vector<2x128xf32>
    %77 = arith.select %74, %75, %76 : vector<2x128xi1>, vector<2x128xf32>
    %78 = arith.truncf %77 : vector<2x128xf32> to vector<2x128xbf16>
    %cst_30 = arith.constant dense<0.000000e+00> : vector<2x384xf32>
    %79 = tpu.matmul %78, %6, %cst_30 {dimension_numbers = #tpu.dot_dimension_numbers<[1], [0], [0], [1], [0, 0, 1, 1], [], []>} : vector<2x128xbf16>, vector<128x384xbf16>, vector<2x384xf32> -> vector<2x384xf32>
    %80 = vector.extract_strided_slice %79 {offsets = [0, 0], sizes = [2, 128], strides = [1, 1]} : vector<2x384xf32> to vector<2x128xf32>
    %81 = vector.extract_strided_slice %79 {offsets = [0, 128], sizes = [2, 128], strides = [1, 1]} : vector<2x384xf32> to vector<2x128xf32>
    %82 = vector.extract_strided_slice %79 {offsets = [0, 256], sizes = [2, 128], strides = [1, 1]} : vector<2x384xf32> to vector<2x128xf32>
    %83 = vector.extract_strided_slice %5 {offsets = [4, 0], sizes = [2, 384], strides = [1, 1]} : vector<16x384xf32> to vector<2x384xf32>
    %84 = vector.extract_strided_slice %83 {offsets = [0, 0], sizes = [2, 128], strides = [1, 1]} : vector<2x384xf32> to vector<2x128xf32>
    %85 = vector.extract_strided_slice %83 {offsets = [0, 128], sizes = [2, 128], strides = [1, 1]} : vector<2x384xf32> to vector<2x128xf32>
    %86 = vector.extract_strided_slice %83 {offsets = [0, 256], sizes = [2, 128], strides = [1, 1]} : vector<2x384xf32> to vector<2x128xf32>
    %87 = arith.addf %84, %80 : vector<2x128xf32>
    %cst_31 = arith.constant 0.000000e+00 : f32
    %88 = vector.broadcast %cst_31 : f32 to vector<2x128xf32>
    %89 = arith.subf %88, %87 : vector<2x128xf32>
    %90 = math.exp %89 : vector<2x128xf32>
    %cst_32 = arith.constant 1.000000e+00 : f32
    %91 = vector.broadcast %cst_32 : f32 to vector<2x128xf32>
    %92 = arith.addf %91, %90 : vector<2x128xf32>
    %cst_33 = arith.constant 1.000000e+00 : f32
    %93 = vector.broadcast %cst_33 : f32 to vector<2x128xf32>
    %94 = arith.divf %93, %92 : vector<2x128xf32>
    %95 = arith.addf %85, %81 : vector<2x128xf32>
    %cst_34 = arith.constant 0.000000e+00 : f32
    %96 = vector.broadcast %cst_34 : f32 to vector<2x128xf32>
    %97 = arith.subf %96, %95 : vector<2x128xf32>
    %98 = math.exp %97 : vector<2x128xf32>
    %cst_35 = arith.constant 1.000000e+00 : f32
    %99 = vector.broadcast %cst_35 : f32 to vector<2x128xf32>
    %100 = arith.addf %99, %98 : vector<2x128xf32>
    %cst_36 = arith.constant 1.000000e+00 : f32
    %101 = vector.broadcast %cst_36 : f32 to vector<2x128xf32>
    %102 = arith.divf %101, %100 : vector<2x128xf32>
    %103 = vector.broadcast %7 : vector<1x128xf32> to vector<2x128xf32>
    %104 = arith.addf %82, %103 : vector<2x128xf32>
    %105 = arith.mulf %94, %104 : vector<2x128xf32>
    %106 = arith.addf %86, %105 : vector<2x128xf32>
    %107 = math.tanh %106 : vector<2x128xf32>
    %cst_37 = arith.constant 1.000000e+00 : f32
    %108 = vector.broadcast %cst_37 : f32 to vector<2x128xf32>
    %109 = arith.subf %108, %102 : vector<2x128xf32>
    %110 = arith.mulf %109, %107 : vector<2x128xf32>
    %111 = arith.mulf %102, %77 : vector<2x128xf32>
    %112 = arith.addf %110, %111 : vector<2x128xf32>
    %cst_38 = arith.constant 0.000000e+00 : f32
    %113 = vector.broadcast %cst_38 : f32 to vector<2x128xf32>
    %114 = arith.cmpf oge, %112, %113 : vector<2x128xf32>
    %cst_39 = arith.constant 1.000000e+00 : f32
    %cst_40 = arith.constant -1.000000e+00 : f32
    %115 = vector.broadcast %cst_39 : f32 to vector<2x128xf32>
    %116 = vector.broadcast %cst_40 : f32 to vector<2x128xf32>
    %117 = arith.select %114, %115, %116 : vector<2x128xi1>, vector<2x128xf32>
    %118 = arith.truncf %117 : vector<2x128xf32> to vector<2x128xbf16>
    %cst_41 = arith.constant dense<0.000000e+00> : vector<2x384xf32>
    %119 = tpu.matmul %118, %6, %cst_41 {dimension_numbers = #tpu.dot_dimension_numbers<[1], [0], [0], [1], [0, 0, 1, 1], [], []>} : vector<2x128xbf16>, vector<128x384xbf16>, vector<2x384xf32> -> vector<2x384xf32>
    %120 = vector.extract_strided_slice %119 {offsets = [0, 0], sizes = [2, 128], strides = [1, 1]} : vector<2x384xf32> to vector<2x128xf32>
    %121 = vector.extract_strided_slice %119 {offsets = [0, 128], sizes = [2, 128], strides = [1, 1]} : vector<2x384xf32> to vector<2x128xf32>
    %122 = vector.extract_strided_slice %119 {offsets = [0, 256], sizes = [2, 128], strides = [1, 1]} : vector<2x384xf32> to vector<2x128xf32>
    %123 = vector.extract_strided_slice %5 {offsets = [6, 0], sizes = [2, 384], strides = [1, 1]} : vector<16x384xf32> to vector<2x384xf32>
    %124 = vector.extract_strided_slice %123 {offsets = [0, 0], sizes = [2, 128], strides = [1, 1]} : vector<2x384xf32> to vector<2x128xf32>
    %125 = vector.extract_strided_slice %123 {offsets = [0, 128], sizes = [2, 128], strides = [1, 1]} : vector<2x384xf32> to vector<2x128xf32>
    %126 = vector.extract_strided_slice %123 {offsets = [0, 256], sizes = [2, 128], strides = [1, 1]} : vector<2x384xf32> to vector<2x128xf32>
    %127 = arith.addf %124, %120 : vector<2x128xf32>
    %cst_42 = arith.constant 0.000000e+00 : f32
    %128 = vector.broadcast %cst_42 : f32 to vector<2x128xf32>
    %129 = arith.subf %128, %127 : vector<2x128xf32>
    %130 = math.exp %129 : vector<2x128xf32>
    %cst_43 = arith.constant 1.000000e+00 : f32
    %131 = vector.broadcast %cst_43 : f32 to vector<2x128xf32>
    %132 = arith.addf %131, %130 : vector<2x128xf32>
    %cst_44 = arith.constant 1.000000e+00 : f32
    %133 = vector.broadcast %cst_44 : f32 to vector<2x128xf32>
    %134 = arith.divf %133, %132 : vector<2x128xf32>
    %135 = arith.addf %125, %121 : vector<2x128xf32>
    %cst_45 = arith.constant 0.000000e+00 : f32
    %136 = vector.broadcast %cst_45 : f32 to vector<2x128xf32>
    %137 = arith.subf %136, %135 : vector<2x128xf32>
    %138 = math.exp %137 : vector<2x128xf32>
    %cst_46 = arith.constant 1.000000e+00 : f32
    %139 = vector.broadcast %cst_46 : f32 to vector<2x128xf32>
    %140 = arith.addf %139, %138 : vector<2x128xf32>
    %cst_47 = arith.constant 1.000000e+00 : f32
    %141 = vector.broadcast %cst_47 : f32 to vector<2x128xf32>
    %142 = arith.divf %141, %140 : vector<2x128xf32>
    %143 = vector.broadcast %7 : vector<1x128xf32> to vector<2x128xf32>
    %144 = arith.addf %122, %143 : vector<2x128xf32>
    %145 = arith.mulf %134, %144 : vector<2x128xf32>
    %146 = arith.addf %126, %145 : vector<2x128xf32>
    %147 = math.tanh %146 : vector<2x128xf32>
    %cst_48 = arith.constant 1.000000e+00 : f32
    %148 = vector.broadcast %cst_48 : f32 to vector<2x128xf32>
    %149 = arith.subf %148, %142 : vector<2x128xf32>
    %150 = arith.mulf %149, %147 : vector<2x128xf32>
    %151 = arith.mulf %142, %117 : vector<2x128xf32>
    %152 = arith.addf %150, %151 : vector<2x128xf32>
    %cst_49 = arith.constant 0.000000e+00 : f32
    %153 = vector.broadcast %cst_49 : f32 to vector<2x128xf32>
    %154 = arith.cmpf oge, %152, %153 : vector<2x128xf32>
    %cst_50 = arith.constant 1.000000e+00 : f32
    %cst_51 = arith.constant -1.000000e+00 : f32
    %155 = vector.broadcast %cst_50 : f32 to vector<2x128xf32>
    %156 = vector.broadcast %cst_51 : f32 to vector<2x128xf32>
    %157 = arith.select %154, %155, %156 : vector<2x128xi1>, vector<2x128xf32>
    %158 = arith.truncf %157 : vector<2x128xf32> to vector<2x128xbf16>
    %cst_52 = arith.constant dense<0.000000e+00> : vector<2x384xf32>
    %159 = tpu.matmul %158, %6, %cst_52 {dimension_numbers = #tpu.dot_dimension_numbers<[1], [0], [0], [1], [0, 0, 1, 1], [], []>} : vector<2x128xbf16>, vector<128x384xbf16>, vector<2x384xf32> -> vector<2x384xf32>
    %160 = vector.extract_strided_slice %159 {offsets = [0, 0], sizes = [2, 128], strides = [1, 1]} : vector<2x384xf32> to vector<2x128xf32>
    %161 = vector.extract_strided_slice %159 {offsets = [0, 128], sizes = [2, 128], strides = [1, 1]} : vector<2x384xf32> to vector<2x128xf32>
    %162 = vector.extract_strided_slice %159 {offsets = [0, 256], sizes = [2, 128], strides = [1, 1]} : vector<2x384xf32> to vector<2x128xf32>
    %163 = vector.extract_strided_slice %5 {offsets = [8, 0], sizes = [2, 384], strides = [1, 1]} : vector<16x384xf32> to vector<2x384xf32>
    %164 = vector.extract_strided_slice %163 {offsets = [0, 0], sizes = [2, 128], strides = [1, 1]} : vector<2x384xf32> to vector<2x128xf32>
    %165 = vector.extract_strided_slice %163 {offsets = [0, 128], sizes = [2, 128], strides = [1, 1]} : vector<2x384xf32> to vector<2x128xf32>
    %166 = vector.extract_strided_slice %163 {offsets = [0, 256], sizes = [2, 128], strides = [1, 1]} : vector<2x384xf32> to vector<2x128xf32>
    %167 = arith.addf %164, %160 : vector<2x128xf32>
    %cst_53 = arith.constant 0.000000e+00 : f32
    %168 = vector.broadcast %cst_53 : f32 to vector<2x128xf32>
    %169 = arith.subf %168, %167 : vector<2x128xf32>
    %170 = math.exp %169 : vector<2x128xf32>
    %cst_54 = arith.constant 1.000000e+00 : f32
    %171 = vector.broadcast %cst_54 : f32 to vector<2x128xf32>
    %172 = arith.addf %171, %170 : vector<2x128xf32>
    %cst_55 = arith.constant 1.000000e+00 : f32
    %173 = vector.broadcast %cst_55 : f32 to vector<2x128xf32>
    %174 = arith.divf %173, %172 : vector<2x128xf32>
    %175 = arith.addf %165, %161 : vector<2x128xf32>
    %cst_56 = arith.constant 0.000000e+00 : f32
    %176 = vector.broadcast %cst_56 : f32 to vector<2x128xf32>
    %177 = arith.subf %176, %175 : vector<2x128xf32>
    %178 = math.exp %177 : vector<2x128xf32>
    %cst_57 = arith.constant 1.000000e+00 : f32
    %179 = vector.broadcast %cst_57 : f32 to vector<2x128xf32>
    %180 = arith.addf %179, %178 : vector<2x128xf32>
    %cst_58 = arith.constant 1.000000e+00 : f32
    %181 = vector.broadcast %cst_58 : f32 to vector<2x128xf32>
    %182 = arith.divf %181, %180 : vector<2x128xf32>
    %183 = vector.broadcast %7 : vector<1x128xf32> to vector<2x128xf32>
    %184 = arith.addf %162, %183 : vector<2x128xf32>
    %185 = arith.mulf %174, %184 : vector<2x128xf32>
    %186 = arith.addf %166, %185 : vector<2x128xf32>
    %187 = math.tanh %186 : vector<2x128xf32>
    %cst_59 = arith.constant 1.000000e+00 : f32
    %188 = vector.broadcast %cst_59 : f32 to vector<2x128xf32>
    %189 = arith.subf %188, %182 : vector<2x128xf32>
    %190 = arith.mulf %189, %187 : vector<2x128xf32>
    %191 = arith.mulf %182, %157 : vector<2x128xf32>
    %192 = arith.addf %190, %191 : vector<2x128xf32>
    %cst_60 = arith.constant 0.000000e+00 : f32
    %193 = vector.broadcast %cst_60 : f32 to vector<2x128xf32>
    %194 = arith.cmpf oge, %192, %193 : vector<2x128xf32>
    %cst_61 = arith.constant 1.000000e+00 : f32
    %cst_62 = arith.constant -1.000000e+00 : f32
    %195 = vector.broadcast %cst_61 : f32 to vector<2x128xf32>
    %196 = vector.broadcast %cst_62 : f32 to vector<2x128xf32>
    %197 = arith.select %194, %195, %196 : vector<2x128xi1>, vector<2x128xf32>
    %198 = arith.truncf %197 : vector<2x128xf32> to vector<2x128xbf16>
    %cst_63 = arith.constant dense<0.000000e+00> : vector<2x384xf32>
    %199 = tpu.matmul %198, %6, %cst_63 {dimension_numbers = #tpu.dot_dimension_numbers<[1], [0], [0], [1], [0, 0, 1, 1], [], []>} : vector<2x128xbf16>, vector<128x384xbf16>, vector<2x384xf32> -> vector<2x384xf32>
    %200 = vector.extract_strided_slice %199 {offsets = [0, 0], sizes = [2, 128], strides = [1, 1]} : vector<2x384xf32> to vector<2x128xf32>
    %201 = vector.extract_strided_slice %199 {offsets = [0, 128], sizes = [2, 128], strides = [1, 1]} : vector<2x384xf32> to vector<2x128xf32>
    %202 = vector.extract_strided_slice %199 {offsets = [0, 256], sizes = [2, 128], strides = [1, 1]} : vector<2x384xf32> to vector<2x128xf32>
    %203 = vector.extract_strided_slice %5 {offsets = [10, 0], sizes = [2, 384], strides = [1, 1]} : vector<16x384xf32> to vector<2x384xf32>
    %204 = vector.extract_strided_slice %203 {offsets = [0, 0], sizes = [2, 128], strides = [1, 1]} : vector<2x384xf32> to vector<2x128xf32>
    %205 = vector.extract_strided_slice %203 {offsets = [0, 128], sizes = [2, 128], strides = [1, 1]} : vector<2x384xf32> to vector<2x128xf32>
    %206 = vector.extract_strided_slice %203 {offsets = [0, 256], sizes = [2, 128], strides = [1, 1]} : vector<2x384xf32> to vector<2x128xf32>
    %207 = arith.addf %204, %200 : vector<2x128xf32>
    %cst_64 = arith.constant 0.000000e+00 : f32
    %208 = vector.broadcast %cst_64 : f32 to vector<2x128xf32>
    %209 = arith.subf %208, %207 : vector<2x128xf32>
    %210 = math.exp %209 : vector<2x128xf32>
    %cst_65 = arith.constant 1.000000e+00 : f32
    %211 = vector.broadcast %cst_65 : f32 to vector<2x128xf32>
    %212 = arith.addf %211, %210 : vector<2x128xf32>
    %cst_66 = arith.constant 1.000000e+00 : f32
    %213 = vector.broadcast %cst_66 : f32 to vector<2x128xf32>
    %214 = arith.divf %213, %212 : vector<2x128xf32>
    %215 = arith.addf %205, %201 : vector<2x128xf32>
    %cst_67 = arith.constant 0.000000e+00 : f32
    %216 = vector.broadcast %cst_67 : f32 to vector<2x128xf32>
    %217 = arith.subf %216, %215 : vector<2x128xf32>
    %218 = math.exp %217 : vector<2x128xf32>
    %cst_68 = arith.constant 1.000000e+00 : f32
    %219 = vector.broadcast %cst_68 : f32 to vector<2x128xf32>
    %220 = arith.addf %219, %218 : vector<2x128xf32>
    %cst_69 = arith.constant 1.000000e+00 : f32
    %221 = vector.broadcast %cst_69 : f32 to vector<2x128xf32>
    %222 = arith.divf %221, %220 : vector<2x128xf32>
    %223 = vector.broadcast %7 : vector<1x128xf32> to vector<2x128xf32>
    %224 = arith.addf %202, %223 : vector<2x128xf32>
    %225 = arith.mulf %214, %224 : vector<2x128xf32>
    %226 = arith.addf %206, %225 : vector<2x128xf32>
    %227 = math.tanh %226 : vector<2x128xf32>
    %cst_70 = arith.constant 1.000000e+00 : f32
    %228 = vector.broadcast %cst_70 : f32 to vector<2x128xf32>
    %229 = arith.subf %228, %222 : vector<2x128xf32>
    %230 = arith.mulf %229, %227 : vector<2x128xf32>
    %231 = arith.mulf %222, %197 : vector<2x128xf32>
    %232 = arith.addf %230, %231 : vector<2x128xf32>
    %cst_71 = arith.constant 0.000000e+00 : f32
    %233 = vector.broadcast %cst_71 : f32 to vector<2x128xf32>
    %234 = arith.cmpf oge, %232, %233 : vector<2x128xf32>
    %cst_72 = arith.constant 1.000000e+00 : f32
    %cst_73 = arith.constant -1.000000e+00 : f32
    %235 = vector.broadcast %cst_72 : f32 to vector<2x128xf32>
    %236 = vector.broadcast %cst_73 : f32 to vector<2x128xf32>
    %237 = arith.select %234, %235, %236 : vector<2x128xi1>, vector<2x128xf32>
    %238 = arith.truncf %237 : vector<2x128xf32> to vector<2x128xbf16>
    %cst_74 = arith.constant dense<0.000000e+00> : vector<2x384xf32>
    %239 = tpu.matmul %238, %6, %cst_74 {dimension_numbers = #tpu.dot_dimension_numbers<[1], [0], [0], [1], [0, 0, 1, 1], [], []>} : vector<2x128xbf16>, vector<128x384xbf16>, vector<2x384xf32> -> vector<2x384xf32>
    %240 = vector.extract_strided_slice %239 {offsets = [0, 0], sizes = [2, 128], strides = [1, 1]} : vector<2x384xf32> to vector<2x128xf32>
    %241 = vector.extract_strided_slice %239 {offsets = [0, 128], sizes = [2, 128], strides = [1, 1]} : vector<2x384xf32> to vector<2x128xf32>
    %242 = vector.extract_strided_slice %239 {offsets = [0, 256], sizes = [2, 128], strides = [1, 1]} : vector<2x384xf32> to vector<2x128xf32>
    %243 = vector.extract_strided_slice %5 {offsets = [12, 0], sizes = [2, 384], strides = [1, 1]} : vector<16x384xf32> to vector<2x384xf32>
    %244 = vector.extract_strided_slice %243 {offsets = [0, 0], sizes = [2, 128], strides = [1, 1]} : vector<2x384xf32> to vector<2x128xf32>
    %245 = vector.extract_strided_slice %243 {offsets = [0, 128], sizes = [2, 128], strides = [1, 1]} : vector<2x384xf32> to vector<2x128xf32>
    %246 = vector.extract_strided_slice %243 {offsets = [0, 256], sizes = [2, 128], strides = [1, 1]} : vector<2x384xf32> to vector<2x128xf32>
    %247 = arith.addf %244, %240 : vector<2x128xf32>
    %cst_75 = arith.constant 0.000000e+00 : f32
    %248 = vector.broadcast %cst_75 : f32 to vector<2x128xf32>
    %249 = arith.subf %248, %247 : vector<2x128xf32>
    %250 = math.exp %249 : vector<2x128xf32>
    %cst_76 = arith.constant 1.000000e+00 : f32
    %251 = vector.broadcast %cst_76 : f32 to vector<2x128xf32>
    %252 = arith.addf %251, %250 : vector<2x128xf32>
    %cst_77 = arith.constant 1.000000e+00 : f32
    %253 = vector.broadcast %cst_77 : f32 to vector<2x128xf32>
    %254 = arith.divf %253, %252 : vector<2x128xf32>
    %255 = arith.addf %245, %241 : vector<2x128xf32>
    %cst_78 = arith.constant 0.000000e+00 : f32
    %256 = vector.broadcast %cst_78 : f32 to vector<2x128xf32>
    %257 = arith.subf %256, %255 : vector<2x128xf32>
    %258 = math.exp %257 : vector<2x128xf32>
    %cst_79 = arith.constant 1.000000e+00 : f32
    %259 = vector.broadcast %cst_79 : f32 to vector<2x128xf32>
    %260 = arith.addf %259, %258 : vector<2x128xf32>
    %cst_80 = arith.constant 1.000000e+00 : f32
    %261 = vector.broadcast %cst_80 : f32 to vector<2x128xf32>
    %262 = arith.divf %261, %260 : vector<2x128xf32>
    %263 = vector.broadcast %7 : vector<1x128xf32> to vector<2x128xf32>
    %264 = arith.addf %242, %263 : vector<2x128xf32>
    %265 = arith.mulf %254, %264 : vector<2x128xf32>
    %266 = arith.addf %246, %265 : vector<2x128xf32>
    %267 = math.tanh %266 : vector<2x128xf32>
    %cst_81 = arith.constant 1.000000e+00 : f32
    %268 = vector.broadcast %cst_81 : f32 to vector<2x128xf32>
    %269 = arith.subf %268, %262 : vector<2x128xf32>
    %270 = arith.mulf %269, %267 : vector<2x128xf32>
    %271 = arith.mulf %262, %237 : vector<2x128xf32>
    %272 = arith.addf %270, %271 : vector<2x128xf32>
    %cst_82 = arith.constant 0.000000e+00 : f32
    %273 = vector.broadcast %cst_82 : f32 to vector<2x128xf32>
    %274 = arith.cmpf oge, %272, %273 : vector<2x128xf32>
    %cst_83 = arith.constant 1.000000e+00 : f32
    %cst_84 = arith.constant -1.000000e+00 : f32
    %275 = vector.broadcast %cst_83 : f32 to vector<2x128xf32>
    %276 = vector.broadcast %cst_84 : f32 to vector<2x128xf32>
    %277 = arith.select %274, %275, %276 : vector<2x128xi1>, vector<2x128xf32>
    %278 = arith.truncf %277 : vector<2x128xf32> to vector<2x128xbf16>
    %cst_85 = arith.constant dense<0.000000e+00> : vector<2x384xf32>
    %279 = tpu.matmul %278, %6, %cst_85 {dimension_numbers = #tpu.dot_dimension_numbers<[1], [0], [0], [1], [0, 0, 1, 1], [], []>} : vector<2x128xbf16>, vector<128x384xbf16>, vector<2x384xf32> -> vector<2x384xf32>
    %280 = vector.extract_strided_slice %279 {offsets = [0, 0], sizes = [2, 128], strides = [1, 1]} : vector<2x384xf32> to vector<2x128xf32>
    %281 = vector.extract_strided_slice %279 {offsets = [0, 128], sizes = [2, 128], strides = [1, 1]} : vector<2x384xf32> to vector<2x128xf32>
    %282 = vector.extract_strided_slice %279 {offsets = [0, 256], sizes = [2, 128], strides = [1, 1]} : vector<2x384xf32> to vector<2x128xf32>
    %283 = vector.extract_strided_slice %5 {offsets = [14, 0], sizes = [2, 384], strides = [1, 1]} : vector<16x384xf32> to vector<2x384xf32>
    %284 = vector.extract_strided_slice %283 {offsets = [0, 0], sizes = [2, 128], strides = [1, 1]} : vector<2x384xf32> to vector<2x128xf32>
    %285 = vector.extract_strided_slice %283 {offsets = [0, 128], sizes = [2, 128], strides = [1, 1]} : vector<2x384xf32> to vector<2x128xf32>
    %286 = vector.extract_strided_slice %283 {offsets = [0, 256], sizes = [2, 128], strides = [1, 1]} : vector<2x384xf32> to vector<2x128xf32>
    %287 = arith.addf %284, %280 : vector<2x128xf32>
    %cst_86 = arith.constant 0.000000e+00 : f32
    %288 = vector.broadcast %cst_86 : f32 to vector<2x128xf32>
    %289 = arith.subf %288, %287 : vector<2x128xf32>
    %290 = math.exp %289 : vector<2x128xf32>
    %cst_87 = arith.constant 1.000000e+00 : f32
    %291 = vector.broadcast %cst_87 : f32 to vector<2x128xf32>
    %292 = arith.addf %291, %290 : vector<2x128xf32>
    %cst_88 = arith.constant 1.000000e+00 : f32
    %293 = vector.broadcast %cst_88 : f32 to vector<2x128xf32>
    %294 = arith.divf %293, %292 : vector<2x128xf32>
    %295 = arith.addf %285, %281 : vector<2x128xf32>
    %cst_89 = arith.constant 0.000000e+00 : f32
    %296 = vector.broadcast %cst_89 : f32 to vector<2x128xf32>
    %297 = arith.subf %296, %295 : vector<2x128xf32>
    %298 = math.exp %297 : vector<2x128xf32>
    %cst_90 = arith.constant 1.000000e+00 : f32
    %299 = vector.broadcast %cst_90 : f32 to vector<2x128xf32>
    %300 = arith.addf %299, %298 : vector<2x128xf32>
    %cst_91 = arith.constant 1.000000e+00 : f32
    %301 = vector.broadcast %cst_91 : f32 to vector<2x128xf32>
    %302 = arith.divf %301, %300 : vector<2x128xf32>
    %303 = vector.broadcast %7 : vector<1x128xf32> to vector<2x128xf32>
    %304 = arith.addf %282, %303 : vector<2x128xf32>
    %305 = arith.mulf %294, %304 : vector<2x128xf32>
    %306 = arith.addf %286, %305 : vector<2x128xf32>
    %307 = math.tanh %306 : vector<2x128xf32>
    %cst_92 = arith.constant 1.000000e+00 : f32
    %308 = vector.broadcast %cst_92 : f32 to vector<2x128xf32>
    %309 = arith.subf %308, %302 : vector<2x128xf32>
    %310 = arith.mulf %309, %307 : vector<2x128xf32>
    %311 = arith.mulf %302, %277 : vector<2x128xf32>
    %312 = arith.addf %310, %311 : vector<2x128xf32>
    %cst_93 = arith.constant 0.000000e+00 : f32
    %313 = vector.broadcast %cst_93 : f32 to vector<2x128xf32>
    %314 = arith.cmpf oge, %312, %313 : vector<2x128xf32>
    %cst_94 = arith.constant 1.000000e+00 : f32
    %cst_95 = arith.constant -1.000000e+00 : f32
    %315 = vector.broadcast %cst_94 : f32 to vector<2x128xf32>
    %316 = vector.broadcast %cst_95 : f32 to vector<2x128xf32>
    %317 = arith.select %314, %315, %316 : vector<2x128xi1>, vector<2x128xf32>
    %318 = vector.extract_strided_slice %317 {offsets = [0, 0], sizes = [2, 32], strides = [1, 1]} : vector<2x128xf32> to vector<2x32xf32>
    %c0_96 = arith.constant 0 : index
    %c0_97 = arith.constant 0 : index
    %319 = vector.load %arg5[%c0_96, %c0_97] : memref<2x32xf32, #tpu.memory_space<vmem>>, vector<2x32xf32>
    tpu.vector_store %arg5[%c0_96, %c0_97], %318 {strides = array<i32>} : memref<2x32xf32, #tpu.memory_space<vmem>>, vector<2x32xf32>,
    return
  }
}

</mosaic_0001>

<bundles_post_ra>
// kernel: tpu_custom_call.1
= control target key start
LH: loop header
LB: loop body
LE: loop exit
PB: predicated region body
PF: predicated region fallthrough
CT: control target
= control target key end

     0   :  { %10 = vsyncpa [#allocation3], 0  ;;  %s2231_s0 = inlined_call_operand.hbm [shape: f32[16,16], index: 0, kind: input, shape index: {}]   ;;  %s2232_s1 = inlined_call_operand.hbm [shape: f32[16,384], index: 1, kind: input, shape index: {}]   ;;  %s2233_s2 = inlined_call_operand.hbm [shape: bf16[128,384], index: 2, kind: input, shape index: {}]   ;;  %s2234_s3 = inlined_call_operand.vmem [shape: f32[1,384], index: 3, kind: input, shape index: {}]   ;;  %s2235_s4 = inlined_call_operand.vmem [shape: f32[1,128], index: 4, kind: input, shape index: {}]   ;;  %s2236_s5 = inlined_call_operand.hbm [shape: f32[2,32], index: 5, kind: output, shape index: {}]  }
   0x1   :  { %11 = vsyncpa [#allocation6], 0 }
   0x2   :  { %12 = vsyncpa [#allocation4], 0  ;;  %s1754_s18 = smov [#allocation5]   ;;  %s1660_s22 = scalar_lea.hbm %s2232_s1, 768 }
   0x3   :  { %s30_s19 = sshll.u32 %s1754_s18, 4  ;;  %p1661_p0 = scmp.ne.s32.totalorder %s2232_s1, %s1660_s22  ;;  %s31_s19 = int_to_ptr.vmem [resolvable:$true] %s30_s19 }
   0x4   :  { %p1664_p1 = scmp.lt.u32.totalorder %s1660_s22, %s2232_s1 }
   0x6   :  { %p1666_p2 = pnand %p1664_p1, %p1661_p0 }
   0x8   :  { %1669 = shalt.err (!%p1666_p2)
}
   0x9   :  { %s1670_s27 = scalar_lea.vmem %s31_s19, 768  ;;  %p1675_p4 = scmp.lt.s32.totalorder %s31_s19, %s31_s19 }
   0xa   :  { %p1671_p3 = scmp.ne.s32.totalorder %s31_s19, %s1670_s27  ;;  %p1676_p5 = scmp.lt.s32.totalorder %s1670_s27, %s1670_s27 }
   0xc   :  { %p1677_p6 = por %p1676_p5, %p1675_p4 }
   0xe   :  { %p1678_p7 = pnand %p1677_p6, %p1671_p3 }
  0x10   :  { %1681 = shalt.err (!%p1678_p7)
}
  0x11   :  { %s1755_s28 = smov 384   ;;  %s1756_s29 = smov 24  }
  0x12   :  { %36 = dma.hbm_to_vmem [thread:$0]  %s2232_s1, 768, %s31_s19, [#allocation6], %s1755_s28, %s1755_s28, %s1756_s29  }
  0x13   :  { %s1757_s7 = smov [#allocation2]   ;;  %s1682_s11 = scalar_lea.hbm %s2231_s0, 256 }
  0x14   :  { %s18_s8 = sshll.u32 %s1757_s7, 4  ;;  %p1683_p8 = scmp.ne.s32.totalorder %s2231_s0, %s1682_s11  ;;  %s19_s8 = int_to_ptr.vmem [resolvable:$true] %s18_s8 }
  0x15   :  { %p1686_p9 = scmp.lt.u32.totalorder %s1682_s11, %s2231_s0 }
  0x17   :  { %p1688_p10 = pnand %p1686_p9, %p1683_p8 }
  0x19   :  { %1691 = shalt.err (!%p1688_p10)
}
  0x1a   :  { %s1692_s16 = scalar_lea.vmem %s19_s8, 256  ;;  %p1697_p12 = scmp.lt.s32.totalorder %s19_s8, %s19_s8 }
  0x1b   :  { %p1693_p11 = scmp.ne.s32.totalorder %s19_s8, %s1692_s16  ;;  %p1698_p13 = scmp.lt.s32.totalorder %s1692_s16, %s1692_s16 }
  0x1d   :  { %p1699_p0 = por %p1698_p13, %p1697_p12 }
  0x1f   :  { %p1700_p1 = pnand %p1699_p0, %p1693_p11 }
  0x21   :  { %1703 = shalt.err (!%p1700_p1)
}
  0x22   :  { %s1758_s1 = smov 128   ;;  %s1759_s17 = smov 8  }
  0x23   :  { %24 = dma.hbm_to_vmem [thread:$0]  %s2231_s0, 256, %s19_s8, [#allocation3], %s1758_s1, %s1758_s1, %s1759_s17  }
  0x24   :  { %s1760_s20 = smov [#allocation7]   ;;  %s1704_s24 = scalar_lea.hbm %s2233_s2, 3072 }
  0x25   :  { %s42_s21 = sshll.u32 %s1760_s20, 4  ;;  %p1705_p2 = scmp.ne.s32.totalorder %s2233_s2, %s1704_s24  ;;  %s43_s21 = int_to_ptr.vmem [resolvable:$true] %s42_s21 }
  0x26   :  { %p1708_p3 = scmp.lt.u32.totalorder %s1704_s24, %s2233_s2 }
  0x28   :  { %p1710_p4 = pnand %p1708_p3, %p1705_p2 }
  0x2a   :  { %1713 = shalt.err (!%p1710_p4)
}
  0x2b   :  { %s1714_s29 = scalar_lea.vmem %s43_s21, 3072  ;;  %p1719_p6 = scmp.lt.s32.totalorder %s43_s21, %s43_s21 }
  0x2c   :  { %p1715_p5 = scmp.ne.s32.totalorder %s43_s21, %s1714_s29  ;;  %p1720_p7 = scmp.lt.s32.totalorder %s1714_s29, %s1714_s29 }
  0x2e   :  { %p1721_p8 = por %p1720_p7, %p1719_p6 }
  0x30   :  { %p1722_p9 = pnand %p1721_p8, %p1715_p5 }
  0x32   :  { %1725 = shalt.err (!%p1722_p9)
}
  0x33   :  { %s1761_s0 = smov 192   ;;  %s1762_s30 = smov 12  }
  0x34   :  { %48 = dma.hbm_to_vmem [thread:$0]  %s2233_s2, 3072, %s43_s21, [#allocation6], %s1761_s0, %s1761_s0, %s1762_s30  }
  0x35   :  { %1748 = dma.done.wait [#allocation3], 256  }
  0x36   :  { %1749 = vsyncadd [#allocation3], 4294967040 }
  0x37   :  { %1750 = dma.done.wait [#allocation6], 3840  }
  0x38   :  { %1751 = vsyncadd [#allocation6], 4294963456  ;;  %v1763_v0 = vmov 0.0   ;;  %v66_v1 = vld [vmem:[#allocation5 + $0x8] sm:$0xff]  ;;  %v69_v2 = vld [vmem:[#allocation5 + $0x20] sm:$0xff]  ;;  %vm88_vm0 = vcmask 130048   ;;  %v73_v37 = vlaneseq }
  0x39   :  { %159 = vmatprep.mubr.f32.mxu0 %v1763_v0  ;;  %v65_v3 = vld [vmem:[#allocation5] sm:$0xff]  ;;  %v1526_v4 = vpack.c.bf16 %v69_v2, %v66_v1  ;;  %v68_v5 = vld [vmem:[#allocation5 + $0x18] sm:$0xff]  ;;  %v63_v6 = vld [vmem:[#allocation2] sm:$0xff]  ;;  %v1764_v31 = vmov 0   ;;  %vm1765_vm1 = vmmov 0   ;;  %vm1265_vm9 = vcmask 261126  }
  0x3a   :  { %v67_v7 = vld [vmem:[#allocation5 + $0x10] sm:$0xff]  ;;  %v1528_v8 = vpack.c.bf16 %v68_v5, %v65_v3  ;;  %v70_v9 = vld [vmem:[#allocation5 + $0x28] sm:$0xff]  ;;  %1383 = vmatprep.mubr.msk.f32.mxu1 %vm88_vm0, %v63_v6  ;;  %v64_v11 = vld [vmem:[#allocation2 + $0x8] sm:$0xff]  ;;  %v74_v38 = vshrl.u32 %v73_v37, 7 }
  0x3b   :  { %1527 = vmatprep.subr.bf16.mxu0 %v1526_v4  ;;  %v1530_v10 = vpack.c.bf16 %v70_v9, %v67_v7  ;;  %v1837_v12 = vld [vmem:[#allocation7 + $0x4] ss:$12 sps:$4 sm:$0xff]   ;;  %v1839_v13 = vld [vmem:[#allocation7] ss:$12 sps:$4 sm:$0xff]   ;;  %v1841_v14 = vld [vmem:[#allocation7 + $0x8] ss:$12 sps:$4 sm:$0xff]  }
  0x3c   :  { %1529 = vmatpush1.bf16.msra.mxu0 %v1528_v8  ;;  %v1846_v15 = vld [vmem:[#allocation7 + $0x1c] ss:$12 sps:$4 sm:$0xff]   ;;  %v1849_v16 = vld [vmem:[#allocation7 + $0x18] ss:$12 sps:$4 sm:$0xff]   ;;  %v1851_v17 = vld [vmem:[#allocation7 + $0x20] ss:$12 sps:$4 sm:$0xff]  }
  0x3d   :  { %1531 = vmatprep.subr.bf16.mxu1 %v1530_v10  ;;  %434 = vmatprep.subr.bf16.mxu0 %v1837_v12  ;;  %v1856_v18 = vld [vmem:[#allocation7 + $0x34] ss:$12 sps:$4 sm:$0xff]   ;;  %v1859_v19 = vld [vmem:[#allocation7 + $0x30] ss:$12 sps:$4 sm:$0xff]   ;;  %v1861_v20 = vld [vmem:[#allocation7 + $0x38] ss:$12 sps:$4 sm:$0xff]  }
  0x3e   :  { %1533 = vmatpush3.bf16.msra.mxu1 %v1530_v10  ;;  %v1866_v21 = vld [vmem:[#allocation7 + $0x4c] ss:$12 sps:$4 sm:$0xff]   ;;  %v1869_v22 = vld [vmem:[#allocation7 + $0x48] ss:$12 sps:$4 sm:$0xff]   ;;  %v1871_v23 = vld [vmem:[#allocation7 + $0x50] ss:$12 sps:$4 sm:$0xff]  }
  0x3f   :  { %1283 = vmatmul.mubr.msk.f32.vlgmr.msra.gmra.mrb[0].mxu0 %vm88_vm0, %v63_v6  ;;  %1386 = vmatprep.subr.bf16.mxu1 %v1763_v0  ;;  %v1876_v24 = vld [vmem:[#allocation7 + $0x64] ss:$12 sps:$4 sm:$0xff]   ;;  %v1879_v25 = vld [vmem:[#allocation7 + $0x60] ss:$12 sps:$4 sm:$0xff]   ;;  %v1881_v26 = vld [vmem:[#allocation7 + $0x68] ss:$12 sps:$4 sm:$0xff]  }
  0x40   :  { %165 = vmatprep.mubr.f32.mxu0 %v1763_v0  ;;  %435 = vmatpush1.bf16.msra.mxu0 %v1839_v13  ;;  %v1883_v27 = vld [vmem:[#allocation7 + $0x7c] ss:$12 sps:$4 sm:$0xff]   ;;  %v1888_v28 = vld [vmem:[#allocation7 + $0x78] ss:$12 sps:$4 sm:$0xff]   ;;  %v1890_v29 = vld [vmem:[#allocation7 + $0x80] ss:$12 sps:$4 sm:$0xff]  }
  0x41   :  { %1384 = vmatmul.mubr.msk.f32.vlgmr.msra.gmra.mrb[0].mxu1 %vm88_vm0, %v64_v11  ;;  %436 = vmatprep.subr.bf16.mxu0 %v1846_v15  ;;  %v1894_v30 = vld [vmem:[#allocation7 + $0x94] ss:$12 sps:$4 sm:$0xff]   ;;  %v1901_v32 = vld [vmem:[#allocation7 + $0x90] ss:$12 sps:$4 sm:$0xff]   ;;  %v1903_v33 = vld [vmem:[#allocation7 + $0x98] ss:$12 sps:$4 sm:$0xff]  }
  0x42   :  { %1387 = vmatpush3.bf16.msra.mxu1 %v1841_v14  ;;  %1402 = vmatprep.mubr.msk.bf16.mxu1 %vm1765_vm1, %v1763_v0  ;;  %v1907_v34 = vld [vmem:[#allocation7 + $0xac] ss:$12 sps:$4 sm:$0xff]   ;;  %v1911_v35 = vld [vmem:[#allocation7 + $0xa8] ss:$12 sps:$4 sm:$0xff]   ;;  %v1913_v36 = vld [vmem:[#allocation7 + $0xb0] ss:$12 sps:$4 sm:$0xff]  }
  0x43   :  { %1284 = vmatmul.mubr.msk.f32.gmra.mrb[2].mxu0 %vm88_vm0, %v64_v11  ;;  %1388 = vmatprep.subr.bf16.mxu1 %v1763_v0  ;;  %v75_v39 = vsub.s32 0, %v74_v38  ;;  %v71_v40 = vld [vmem:[%s2234_s3] sm:$0x7]  ;;  %v79_v41 = vsub.s32 1, %v74_v38  ;;  %v83_v42 = vsub.s32 2, %v74_v38  ;;  %v1766_v11 = vmov -1.0  }
  0x44   :  { %437 = vmatpush1.bf16.msra.mxu0 %v1849_v16  ;;  %466 = vmatprep.mubr.bf16.mxu0 %v1764_v31  ;;  %v1939_v2 = vld [vmem:[%s2235_s4] ss:$0 sm:$0xff]  ;;  %s1767_s4 = smov [#allocation8]  }
  0x45   :  { %438 = vmatprep.subr.bf16.mxu0 %v1856_v18  ;;  %v76_v43 = vrot.slane %v71_v40, %v75_v39  ;;  %v80_v44 = vrot.slane %v71_v40, %v79_v41  ;;  %v84_v45 = vrot.slane %v71_v40, %v83_v42  ;;  %s1273_s10 = sshll.u32 %s1767_s4, 4  ;;  %s1274_s10 = int_to_ptr.vmem [resolvable:$true] %s1273_s10 }
  0x46   :  { %1389 = vmatpush3.bf16.msra.mxu1 %v1851_v17  ;;  %s1726_s11 = scalar_lea.vmem %s1274_s10, 32  ;;  %p1731_p11 = scmp.lt.s32.totalorder %s1274_s10, %s1274_s10 }
  0x47   :  { %1390 = vmatprep.subr.bf16.mxu1 %v1763_v0  ;;  %p1727_p10 = scmp.ne.s32.totalorder %s1274_s10, %s1726_s11  ;;  %p1732_p12 = scmp.lt.s32.totalorder %s1726_s11, %s1726_s11 }
  0x48   :  { %439 = vmatpush1.bf16.msra.mxu0 %v1859_v19 }
  0x49   :  { %440 = vmatprep.subr.bf16.mxu0 %v1866_v21  ;;  %p1733_p13 = por %p1732_p12, %p1731_p11 }
  0x4a   :  { %1391 = vmatpush3.bf16.msra.mxu1 %v1861_v20 }
  0x4b   :  { %1392 = vmatprep.subr.bf16.mxu1 %v1763_v0  ;;  %p1734_p0 = pnand %p1733_p13, %p1727_p10 }
  0x4c   :  { %441 = vmatpush1.bf16.msra.mxu0 %v1869_v22 }
  0x4d   :  { %442 = vmatprep.subr.bf16.mxu0 %v1876_v24 }
  0x4e   :  { %1393 = vmatpush3.bf16.msra.mxu1 %v1871_v23 }
  0x4f   :  { %1394 = vmatprep.subr.bf16.mxu1 %v1763_v0 }
  0x50   :  { %443 = vmatpush1.bf16.msra.mxu0 %v1879_v25 }
  0x51   :  { %444 = vmatprep.subr.bf16.mxu0 %v1883_v27 }
  0x52   :  { %1395 = vmatpush3.bf16.msra.mxu1 %v1881_v26 }
  0x53   :  { %1396 = vmatprep.subr.bf16.mxu1 %v1763_v0 }
  0x54   :  { %445 = vmatpush1.bf16.msra.mxu0 %v1888_v28 }
  0x55   :  { %446 = vmatprep.subr.bf16.mxu0 %v1894_v30 }
  0x56   :  { %1397 = vmatpush3.bf16.msra.mxu1 %v1890_v29 }
  0x57   :  { %1398 = vmatprep.subr.bf16.mxu1 %v1763_v0 }
  0x58   :  { %447 = vmatpush1.bf16.msra.mxu0 %v1901_v32 }
  0x59   :  { %448 = vmatprep.subr.bf16.mxu0 %v1907_v34 }
  0x5a   :  { %1399 = vmatpush3.bf16.msra.mxu1 %v1903_v33 }
  0x5b   :  { %1400 = vmatprep.subr.bf16.mxu1 %v1763_v0 }
  0x5c   :  { %449 = vmatpush1.bf16.msra.mxu0 %v1911_v35 }
  0x5d   :  { %555 = vmatprep.subr.bf16.mxu0 %v1837_v12 }
  0x5e   :  { %1401 = vmatpush3.bf16.msra.mxu1 %v1913_v36 }
  0x5f   :  { %1406 = vmatprep.subr.bf16.mxu1 %v1763_v0 }
 0x112   :  { %v161_v46 = vpop.f32.mrb[0].mxu0 }
 0x113   :  { %v1924_v47 = vadd.f32 %v161_v46, %v76_v43  ;;  %v163_v48 = vpop.f32.mrb[1].mxu0 }
 0x114   :  { %v1926_v49 = vadd.f32 %v163_v48, %v80_v44  ;;  %v1385_v50 = vpop.f32.mrb[0].mxu1 }
 0x115   :  { %v280_v51 = vsub.f32 0.0, %v1924_v47  ;;  %v1929_v52 = vadd.f32 %v1385_v50, %v84_v45  ;;  %v238_v53 = vpop.f32.mrb[1].mxu1 }
 0x116   :  { %v167_v54 = vpop.f32.mrb[2].mxu0  ;;  %v286_v58 = vsub.f32 0.0, %v1926_v49  ;;  %v1941_v3 = vadd.f32 %v238_v53, %v84_v45 }
 0x117   :  { %v281_v55 = vmul.f32 1.442695, %v280_v51  ;;  %v1931_v56 = vadd.f32 %v167_v54, %v76_v43  ;;  %v169_v57 = vpop.f32.mrb[3].mxu0 }
 0x118   :  { %v1934_v59 = vadd.f32 %v169_v57, %v80_v44  ;;  %v287_v60 = vmul.f32 1.442695, %v286_v58 }
 0x119   :  { %1580 = vpow2.f32 %v281_v55 }
 0x11a   :  { %1582 = vpow2.f32 %v287_v60 }
 0x123   :  { %v1581_v61 = vpop.eup %1580 }
 0x124   :  { %v283_v62 = vadd.f32 1.0, %v1581_v61  ;;  %v1583_v63 = vpop.eup %1582 }
 0x125   :  { %v289_v1 = vadd.f32 1.0, %v1583_v63 }
 0x126   :  { %1584 = vrcp.f32 %v283_v62 }
 0x127   :  { %1586 = vrcp.f32 %v289_v1 }
 0x130   :  { %v1585_v4 = vpop.eup %1584 }
 0x131   :  { %v298_v5 = vmul.f32 %v1585_v4, %v1939_v2  ;;  %v1587_v7 = vpop.eup %1586 }
 0x132   :  { %v301_v8 = vsub.f32 1.0, %v1587_v7 }
 0x133   :  { %v299_v6 = vadd.f32 %v298_v5, %v1941_v3 }
 0x135   :  { %1588 = vtanh.f32 %v299_v6 }
 0x13f   :  { %v1589_v9 = vpop.eup %1588 }
 0x140   :  { %v302_v10 = vmul.f32 %v1589_v9, %v301_v8 }
 0x142   :  { %vm303_vm2 = vcmp.ge.f32.partialorder %v302_v10, 0.0 }
 0x143   :  { %v1946_v37 = vsel %vm303_vm2, 1.0, %v1766_v11 }
 0x144   :  { %v305_v38 = vpack.c.bf16 %v1946_v37, %v1946_v37  ;;  %v545_v6 = vrot.slane %v1946_v37, 6 }
 0x146   :  { %467 = vmatmul.mubr.bf16.vlgmr.msra.gmra.mrb[4].mxu0 %v305_v38  ;;  %1403 = vmatmul.mubr.bf16.vlgmr.msra.gmra.mrb[4].mxu1 %v305_v38 }
 0x147   :  { %556 = vmatpush1.bf16.msra.mxu0 %v1839_v13  ;;  %1407 = vmatpush3.bf16.msra.mxu1 %v1841_v14 }
 0x148   :  { %557 = vmatprep.subr.bf16.mxu0 %v1846_v15  ;;  %1408 = vmatprep.subr.bf16.mxu1 %v1763_v0 }
 0x149   :  { %587 = vmatprep.mubr.bf16.mxu0 %v1764_v31  ;;  %1422 = vmatprep.mubr.msk.bf16.mxu1 %vm1765_vm1, %v1763_v0 }
 0x14b   :  { %558 = vmatpush1.bf16.msra.mxu0 %v1849_v16  ;;  %1409 = vmatpush3.bf16.msra.mxu1 %v1851_v17 }
 0x14c   :  { %559 = vmatprep.subr.bf16.mxu0 %v1856_v18  ;;  %1410 = vmatprep.subr.bf16.mxu1 %v1763_v0 }
 0x14f   :  { %560 = vmatpush1.bf16.msra.mxu0 %v1859_v19  ;;  %1411 = vmatpush3.bf16.msra.mxu1 %v1861_v20 }
 0x150   :  { %561 = vmatprep.subr.bf16.mxu0 %v1866_v21  ;;  %1412 = vmatprep.subr.bf16.mxu1 %v1763_v0 }
 0x153   :  { %562 = vmatpush1.bf16.msra.mxu0 %v1869_v22  ;;  %1413 = vmatpush3.bf16.msra.mxu1 %v1871_v23 }
 0x154   :  { %563 = vmatprep.subr.bf16.mxu0 %v1876_v24  ;;  %1414 = vmatprep.subr.bf16.mxu1 %v1763_v0 }
 0x157   :  { %564 = vmatpush1.bf16.msra.mxu0 %v1879_v25  ;;  %1415 = vmatpush3.bf16.msra.mxu1 %v1881_v26 }
 0x158   :  { %565 = vmatprep.subr.bf16.mxu0 %v1883_v27  ;;  %1416 = vmatprep.subr.bf16.mxu1 %v1763_v0 }
 0x15b   :  { %566 = vmatpush1.bf16.msra.mxu0 %v1888_v28  ;;  %1417 = vmatpush3.bf16.msra.mxu1 %v1890_v29 }
 0x15c   :  { %567 = vmatprep.subr.bf16.mxu0 %v1894_v30  ;;  %1418 = vmatprep.subr.bf16.mxu1 %v1763_v0 }
 0x15f   :  { %568 = vmatpush1.bf16.msra.mxu0 %v1901_v32  ;;  %1419 = vmatpush3.bf16.msra.mxu1 %v1903_v33 }
 0x160   :  { %569 = vmatprep.subr.bf16.mxu0 %v1907_v34  ;;  %1420 = vmatprep.subr.bf16.mxu1 %v1763_v0 }
 0x163   :  { %570 = vmatpush1.bf16.msra.mxu0 %v1911_v35  ;;  %1421 = vmatpush3.bf16.msra.mxu1 %v1913_v36 }
 0x164   :  { %676 = vmatprep.subr.bf16.mxu0 %v1837_v12  ;;  %1426 = vmatprep.subr.bf16.mxu1 %v1763_v0 }
 0x219   :  { %v468_v39 = vpop.f32.mrb[4].mxu0  ;;  %v509_v40 = vpop.f32.mrb[4].mxu1 }
 0x21a   :  { %v516_v41 = vrot.slane %v468_v39, 6  ;;  %v470_v42 = vpop.f32.mrb[5].mxu0  ;;  %v1404_v43 = vpop.f32.mrb[5].mxu1  ;;  %v535_v1 = vadd.f32 %v1939_v2, %v509_v40 }
 0x21b   :  { %v526_v44 = vrot.slane %v470_v42, 6  ;;  %v472_v45 = vpop.f32.mrb[6].mxu0  ;;  %v512_v46 = vpop.f32.mrb[6].mxu1 }
 0x21c   :  { %v518_v48 = vadd.f32 %v516_v41, %v1924_v47  ;;  %v473_v50 = vpop.f32.mrb[7].mxu0  ;;  %v1405_v51 = vpop.f32.mrb[7].mxu1  ;;  %v537_v4 = vrot.slane %v535_v1, 6 }
 0x21d   :  { %v528_v53 = vadd.f32 %v526_v44, %v1926_v49 }
 0x21e   :  { %v519_v54 = vsub.f32 0.0, %v518_v48 }
 0x21f   :  { %v529_v55 = vsub.f32 0.0, %v528_v53 }
 0x220   :  { %v520_v57 = vmul.f32 1.442695, %v519_v54 }
 0x221   :  { %v530_v58 = vmul.f32 1.442695, %v529_v55 }
 0x222   :  { %1590 = vpow2.f32 %v520_v57 }
 0x223   :  { %1592 = vpow2.f32 %v530_v58 }
 0x22c   :  { %v1591_v60 = vpop.eup %1590 }
 0x22d   :  { %v1593_v61 = vpop.eup %1592  ;;  %v522_v62 = vadd.f32 1.0, %v1591_v60 }
 0x22e   :  { %v532_v63 = vadd.f32 1.0, %v1593_v61 }
 0x22f   :  { %1594 = vrcp.f32 %v522_v62 }
 0x230   :  { %1596 = vrcp.f32 %v532_v63 }
 0x239   :  { %v1595_v5 = vpop.eup %1594 }
 0x23a   :  { %v1597_v7 = vpop.eup %1596  ;;  %v539_v8 = vmul.f32 %v1595_v5, %v537_v4 }
 0x23b   :  { %v547_v9 = vmul.f32 %v1597_v7, %v545_v6  ;;  %v542_v38 = vsub.f32 1.0, %v1597_v7 }
 0x23c   :  { %v540_v10 = vadd.f32 %v539_v8, %v1941_v3 }
 0x23e   :  { %1598 = vtanh.f32 %v540_v10 }
 0x248   :  { %v1599_v39 = vpop.eup %1598 }
 0x249   :  { %v543_v41 = vmul.f32 %v1599_v39, %v542_v38 }
 0x24b   :  { %v548_v42 = vadd.f32 %v547_v9, %v543_v41 }
 0x24d   :  { %vm549_vm3 = vcmp.ge.f32.partialorder %v548_v42, 0.0 }
 0x24e   :  { %v1991_v43 = vsel %vm549_vm3, 1.0, %v1766_v11 }
 0x24f   :  { %v551_v40 = vpack.c.bf16 %v1991_v43, %v1991_v43  ;;  %v666_v38 = vrot.slane %v1991_v43, 6 }
 0x251   :  { %v553_v44 = vrot.slane %v551_v40, 1 }
 0x253   :  { %588 = vmatmul.mubr.bf16.vlgmr.msra.gmra.mrb[8].mxu0 %v553_v44  ;;  %1423 = vmatmul.mubr.bf16.vlgmr.msra.gmra.mrb[8].mxu1 %v553_v44 }
 0x254   :  { %677 = vmatpush1.bf16.msra.mxu0 %v1839_v13  ;;  %1427 = vmatpush3.bf16.msra.mxu1 %v1841_v14 }
 0x255   :  { %678 = vmatprep.subr.bf16.mxu0 %v1846_v15  ;;  %1428 = vmatprep.subr.bf16.mxu1 %v1763_v0 }
 0x256   :  { %708 = vmatprep.mubr.bf16.mxu0 %v1764_v31  ;;  %1442 = vmatprep.mubr.msk.bf16.mxu1 %vm1765_vm1, %v1763_v0 }
 0x258   :  { %679 = vmatpush1.bf16.msra.mxu0 %v1849_v16  ;;  %1429 = vmatpush3.bf16.msra.mxu1 %v1851_v17 }
 0x259   :  { %680 = vmatprep.subr.bf16.mxu0 %v1856_v18  ;;  %1430 = vmatprep.subr.bf16.mxu1 %v1763_v0 }
 0x25c   :  { %681 = vmatpush1.bf16.msra.mxu0 %v1859_v19  ;;  %1431 = vmatpush3.bf16.msra.mxu1 %v1861_v20 }
 0x25d   :  { %682 = vmatprep.subr.bf16.mxu0 %v1866_v21  ;;  %1432 = vmatprep.subr.bf16.mxu1 %v1763_v0 }
 0x260   :  { %683 = vmatpush1.bf16.msra.mxu0 %v1869_v22  ;;  %1433 = vmatpush3.bf16.msra.mxu1 %v1871_v23 }
 0x261   :  { %684 = vmatprep.subr.bf16.mxu0 %v1876_v24  ;;  %1434 = vmatprep.subr.bf16.mxu1 %v1763_v0 }
 0x264   :  { %685 = vmatpush1.bf16.msra.mxu0 %v1879_v25  ;;  %1435 = vmatpush3.bf16.msra.mxu1 %v1881_v26 }
 0x265   :  { %686 = vmatprep.subr.bf16.mxu0 %v1883_v27  ;;  %1436 = vmatprep.subr.bf16.mxu1 %v1763_v0 }
 0x268   :  { %687 = vmatpush1.bf16.msra.mxu0 %v1888_v28  ;;  %1437 = vmatpush3.bf16.msra.mxu1 %v1890_v29 }
 0x269   :  { %688 = vmatprep.subr.bf16.mxu0 %v1894_v30  ;;  %1438 = vmatprep.subr.bf16.mxu1 %v1763_v0 }
 0x26c   :  { %689 = vmatpush1.bf16.msra.mxu0 %v1901_v32  ;;  %1439 = vmatpush3.bf16.msra.mxu1 %v1903_v33 }
 0x26d   :  { %690 = vmatprep.subr.bf16.mxu0 %v1907_v34  ;;  %1440 = vmatprep.subr.bf16.mxu1 %v1763_v0 }
 0x270   :  { %691 = vmatpush1.bf16.msra.mxu0 %v1911_v35  ;;  %1441 = vmatpush3.bf16.msra.mxu1 %v1913_v36 }
 0x271   :  { %797 = vmatprep.subr.bf16.mxu0 %v1837_v12  ;;  %1446 = vmatprep.subr.bf16.mxu1 %v1763_v0 }
 0x326   :  { %v589_v37 = vpop.f32.mrb[8].mxu0  ;;  %v630_v45 = vpop.f32.mrb[8].mxu1 }
 0x327   :  { %v637_v46 = vrot.slane %v589_v37, 4  ;;  %v591_v48 = vpop.f32.mrb[9].mxu0  ;;  %v1424_v50 = vpop.f32.mrb[9].mxu1  ;;  %v656_v8 = vadd.f32 %v1939_v2, %v630_v45 }
 0x328   :  { %v647_v51 = vrot.slane %v591_v48, 4  ;;  %v593_v53 = vpop.f32.mrb[10].mxu0  ;;  %v633_v54 = vpop.f32.mrb[10].mxu1 }
 0x329   :  { %v639_v55 = vadd.f32 %v637_v46, %v1924_v47  ;;  %v594_v57 = vpop.f32.mrb[11].mxu0  ;;  %v1425_v58 = vpop.f32.mrb[11].mxu1  ;;  %v658_v9 = vrot.slane %v656_v8, 4 }
 0x32a   :  { %v649_v60 = vadd.f32 %v647_v51, %v1926_v49 }
 0x32b   :  { %v640_v61 = vsub.f32 0.0, %v639_v55 }
 0x32c   :  { %v650_v62 = vsub.f32 0.0, %v649_v60 }
 0x32d   :  { %v641_v63 = vmul.f32 1.442695, %v640_v61 }
 0x32e   :  { %v651_v1 = vmul.f32 1.442695, %v650_v62 }
 0x32f   :  { %1600 = vpow2.f32 %v641_v63 }
 0x330   :  { %1602 = vpow2.f32 %v651_v1 }
 0x339   :  { %v1601_v4 = vpop.eup %1600 }
 0x33a   :  { %v1603_v5 = vpop.eup %1602  ;;  %v643_v6 = vadd.f32 1.0, %v1601_v4 }
 0x33b   :  { %v653_v7 = vadd.f32 1.0, %v1603_v5 }
 0x33c   :  { %1604 = vrcp.f32 %v643_v6 }
 0x33d   :  { %1606 = vrcp.f32 %v653_v7 }
 0x346   :  { %v1605_v10 = vpop.eup %1604 }
 0x347   :  { %v1607_v39 = vpop.eup %1606  ;;  %v660_v41 = vmul.f32 %v1605_v10, %v658_v9 }
 0x348   :  { %v668_v42 = vmul.f32 %v1607_v39, %v666_v38  ;;  %v663_v44 = vsub.f32 1.0, %v1607_v39 }
 0x349   :  { %v661_v40 = vadd.f32 %v660_v41, %v1941_v3 }
 0x34b   :  { %1608 = vtanh.f32 %v661_v40 }
 0x355   :  { %v1609_v37 = vpop.eup %1608 }
 0x356   :  { %v664_v46 = vmul.f32 %v1609_v37, %v663_v44 }
 0x358   :  { %v669_v48 = vadd.f32 %v668_v42, %v664_v46 }
 0x35a   :  { %vm670_vm4 = vcmp.ge.f32.partialorder %v669_v48, 0.0 }
 0x35b   :  { %v2036_v50 = vsel %vm670_vm4, 1.0, %v1766_v11 }
 0x35c   :  { %v672_v45 = vpack.c.bf16 %v2036_v50, %v2036_v50  ;;  %v787_v40 = vrot.slane %v2036_v50, 6 }
 0x35e   :  { %v674_v51 = vrot.slane %v672_v45, 2 }
 0x360   :  { %709 = vmatmul.mubr.bf16.vlgmr.msra.gmra.mrb[12].mxu0 %v674_v51  ;;  %1443 = vmatmul.mubr.bf16.vlgmr.msra.gmra.mrb[12].mxu1 %v674_v51 }
 0x361   :  { %798 = vmatpush1.bf16.msra.mxu0 %v1839_v13  ;;  %1447 = vmatpush3.bf16.msra.mxu1 %v1841_v14 }
 0x362   :  { %799 = vmatprep.subr.bf16.mxu0 %v1846_v15  ;;  %1448 = vmatprep.subr.bf16.mxu1 %v1763_v0 }
 0x363   :  { %829 = vmatprep.mubr.bf16.mxu0 %v1764_v31  ;;  %1462 = vmatprep.mubr.msk.bf16.mxu1 %vm1765_vm1, %v1763_v0 }
 0x365   :  { %800 = vmatpush1.bf16.msra.mxu0 %v1849_v16  ;;  %1449 = vmatpush3.bf16.msra.mxu1 %v1851_v17 }
 0x366   :  { %801 = vmatprep.subr.bf16.mxu0 %v1856_v18  ;;  %1450 = vmatprep.subr.bf16.mxu1 %v1763_v0 }
 0x369   :  { %802 = vmatpush1.bf16.msra.mxu0 %v1859_v19  ;;  %1451 = vmatpush3.bf16.msra.mxu1 %v1861_v20 }
 0x36a   :  { %803 = vmatprep.subr.bf16.mxu0 %v1866_v21  ;;  %1452 = vmatprep.subr.bf16.mxu1 %v1763_v0 }
 0x36d   :  { %804 = vmatpush1.bf16.msra.mxu0 %v1869_v22  ;;  %1453 = vmatpush3.bf16.msra.mxu1 %v1871_v23 }
 0x36e   :  { %805 = vmatprep.subr.bf16.mxu0 %v1876_v24  ;;  %1454 = vmatprep.subr.bf16.mxu1 %v1763_v0 }
 0x371   :  { %806 = vmatpush1.bf16.msra.mxu0 %v1879_v25  ;;  %1455 = vmatpush3.bf16.msra.mxu1 %v1881_v26 }
 0x372   :  { %807 = vmatprep.subr.bf16.mxu0 %v1883_v27  ;;  %1456 = vmatprep.subr.bf16.mxu1 %v1763_v0 }
 0x375   :  { %808 = vmatpush1.bf16.msra.mxu0 %v1888_v28  ;;  %1457 = vmatpush3.bf16.msra.mxu1 %v1890_v29 }
 0x376   :  { %809 = vmatprep.subr.bf16.mxu0 %v1894_v30  ;;  %1458 = vmatprep.subr.bf16.mxu1 %v1763_v0 }
 0x379   :  { %810 = vmatpush1.bf16.msra.mxu0 %v1901_v32  ;;  %1459 = vmatpush3.bf16.msra.mxu1 %v1903_v33 }
 0x37a   :  { %811 = vmatprep.subr.bf16.mxu0 %v1907_v34  ;;  %1460 = vmatprep.subr.bf16.mxu1 %v1763_v0 }
 0x37d   :  { %812 = vmatpush1.bf16.msra.mxu0 %v1911_v35  ;;  %1461 = vmatpush3.bf16.msra.mxu1 %v1913_v36 }
 0x37e   :  { %906 = vmatprep.subr.bf16.mxu0 %v1837_v12  ;;  %1466 = vmatprep.subr.bf16.mxu1 %v1763_v0 }
 0x433   :  { %v710_v43 = vpop.f32.mrb[12].mxu0  ;;  %v751_v53 = vpop.f32.mrb[12].mxu1 }
 0x434   :  { %v758_v54 = vrot.slane %v710_v43, 2  ;;  %v712_v55 = vpop.f32.mrb[13].mxu0  ;;  %v1444_v57 = vpop.f32.mrb[13].mxu1  ;;  %v777_v41 = vadd.f32 %v1939_v2, %v751_v53 }
 0x435   :  { %v768_v58 = vrot.slane %v712_v55, 2  ;;  %v714_v60 = vpop.f32.mrb[14].mxu0  ;;  %v754_v61 = vpop.f32.mrb[14].mxu1 }
 0x436   :  { %v760_v62 = vadd.f32 %v758_v54, %v1924_v47  ;;  %v715_v63 = vpop.f32.mrb[15].mxu0  ;;  %v1445_v1 = vpop.f32.mrb[15].mxu1  ;;  %v779_v42 = vrot.slane %v777_v41, 2 }
 0x437   :  { %v770_v4 = vadd.f32 %v768_v58, %v1926_v49 }
 0x438   :  { %v761_v5 = vsub.f32 0.0, %v760_v62 }
 0x439   :  { %v771_v6 = vsub.f32 0.0, %v770_v4 }
 0x43a   :  { %v762_v7 = vmul.f32 1.442695, %v761_v5 }
 0x43b   :  { %v772_v8 = vmul.f32 1.442695, %v771_v6 }
 0x43c   :  { %1610 = vpow2.f32 %v762_v7 }
 0x43d   :  { %1612 = vpow2.f32 %v772_v8 }
 0x446   :  { %v1611_v9 = vpop.eup %1610 }
 0x447   :  { %v1613_v10 = vpop.eup %1612  ;;  %v764_v38 = vadd.f32 1.0, %v1611_v9 }
 0x448   :  { %v774_v39 = vadd.f32 1.0, %v1613_v10 }
 0x449   :  { %1614 = vrcp.f32 %v764_v38 }
 0x44a   :  { %1616 = vrcp.f32 %v774_v39 }
 0x453   :  { %v1615_v47 = vpop.eup %1614 }
 0x454   :  { %v1617_v44 = vpop.eup %1616  ;;  %v781_v49 = vmul.f32 %v1615_v47, %v779_v42 }
 0x455   :  { %v789_v37 = vmul.f32 %v1617_v44, %v787_v40  ;;  %v784_v48 = vsub.f32 1.0, %v1617_v44 }
 0x456   :  { %v782_v46 = vadd.f32 %v781_v49, %v1941_v3 }
 0x458   :  { %1618 = vtanh.f32 %v782_v46 }
 0x462   :  { %v1619_v45 = vpop.eup %1618 }
 0x463   :  { %v785_v51 = vmul.f32 %v1619_v45, %v784_v48 }
 0x465   :  { %v790_v43 = vadd.f32 %v789_v37, %v785_v51 }
 0x467   :  { %vm791_vm5 = vcmp.ge.f32.partialorder %v790_v43, 0.0 }
 0x468   :  { %v2081_v54 = vsel %vm791_vm5, 1.0, %v1766_v11 }
 0x469   :  { %v793_v53 = vpack.c.bf16 %v2081_v54, %v2081_v54  ;;  %v899_v47 = vrot.slane %v2081_v54, 6 }
 0x46b   :  { %v795_v55 = vrot.slane %v793_v53, 3 }
 0x46d   :  { %830 = vmatmul.mubr.bf16.vlgmr.msra.gmra.mrb[16].mxu0 %v795_v55  ;;  %1463 = vmatmul.mubr.bf16.vlgmr.msra.gmra.mrb[16].mxu1 %v795_v55 }
 0x46e   :  { %907 = vmatpush1.bf16.msra.mxu0 %v1839_v13  ;;  %1467 = vmatpush3.bf16.msra.mxu1 %v1841_v14 }
 0x46f   :  { %908 = vmatprep.subr.bf16.mxu0 %v1846_v15  ;;  %1468 = vmatprep.subr.bf16.mxu1 %v1763_v0 }
 0x470   :  { %938 = vmatprep.mubr.bf16.mxu0 %v1764_v31  ;;  %1482 = vmatprep.mubr.msk.bf16.mxu1 %vm1765_vm1, %v1763_v0 }
 0x472   :  { %909 = vmatpush1.bf16.msra.mxu0 %v1849_v16  ;;  %1469 = vmatpush3.bf16.msra.mxu1 %v1851_v17 }
 0x473   :  { %910 = vmatprep.subr.bf16.mxu0 %v1856_v18  ;;  %1470 = vmatprep.subr.bf16.mxu1 %v1763_v0 }
 0x476   :  { %911 = vmatpush1.bf16.msra.mxu0 %v1859_v19  ;;  %1471 = vmatpush3.bf16.msra.mxu1 %v1861_v20 }
 0x477   :  { %912 = vmatprep.subr.bf16.mxu0 %v1866_v21  ;;  %1472 = vmatprep.subr.bf16.mxu1 %v1763_v0 }
 0x47a   :  { %913 = vmatpush1.bf16.msra.mxu0 %v1869_v22  ;;  %1473 = vmatpush3.bf16.msra.mxu1 %v1871_v23 }
 0x47b   :  { %914 = vmatprep.subr.bf16.mxu0 %v1876_v24  ;;  %1474 = vmatprep.subr.bf16.mxu1 %v1763_v0 }
 0x47e   :  { %915 = vmatpush1.bf16.msra.mxu0 %v1879_v25  ;;  %1475 = vmatpush3.bf16.msra.mxu1 %v1881_v26 }
 0x47f   :  { %916 = vmatprep.subr.bf16.mxu0 %v1883_v27  ;;  %1476 = vmatprep.subr.bf16.mxu1 %v1763_v0 }
 0x482   :  { %917 = vmatpush1.bf16.msra.mxu0 %v1888_v28  ;;  %1477 = vmatpush3.bf16.msra.mxu1 %v1890_v29 }
 0x483   :  { %918 = vmatprep.subr.bf16.mxu0 %v1894_v30  ;;  %1478 = vmatprep.subr.bf16.mxu1 %v1763_v0 }
 0x486   :  { %919 = vmatpush1.bf16.msra.mxu0 %v1901_v32  ;;  %1479 = vmatpush3.bf16.msra.mxu1 %v1903_v33 }
 0x487   :  { %920 = vmatprep.subr.bf16.mxu0 %v1907_v34  ;;  %1480 = vmatprep.subr.bf16.mxu1 %v1763_v0 }
 0x48a   :  { %921 = vmatpush1.bf16.msra.mxu0 %v1911_v35  ;;  %1481 = vmatpush3.bf16.msra.mxu1 %v1913_v36 }
 0x48b   :  { %1027 = vmatprep.subr.bf16.mxu0 %v1837_v12  ;;  %1486 = vmatprep.subr.bf16.mxu1 %v1763_v0 }
 0x540   :  { %v831_v3 = vpop.f32.mrb[16].mxu0  ;;  %v872_v50 = vpop.f32.mrb[16].mxu1 }
 0x541   :  { %v878_v57 = vadd.f32 %v831_v3, %v1931_v56  ;;  %v833_v58 = vpop.f32.mrb[17].mxu0  ;;  %v1464_v60 = vpop.f32.mrb[17].mxu1  ;;  %v892_v41 = vadd.f32 %v1939_v2, %v872_v50 }
 0x542   :  { %v885_v61 = vadd.f32 %v833_v58, %v1934_v59  ;;  %v835_v62 = vpop.f32.mrb[18].mxu0  ;;  %v875_v63 = vpop.f32.mrb[18].mxu1 }
 0x543   :  { %v879_v1 = vsub.f32 0.0, %v878_v57  ;;  %v836_v4 = vpop.f32.mrb[19].mxu0  ;;  %v1465_v5 = vpop.f32.mrb[19].mxu1 }
 0x544   :  { %v886_v6 = vsub.f32 0.0, %v885_v61 }
 0x545   :  { %v880_v7 = vmul.f32 1.442695, %v879_v1 }
 0x546   :  { %v887_v8 = vmul.f32 1.442695, %v886_v6 }
 0x547   :  { %1620 = vpow2.f32 %v880_v7 }
 0x548   :  { %1622 = vpow2.f32 %v887_v8 }
 0x551   :  { %v1621_v9 = vpop.eup %1620 }
 0x552   :  { %v1623_v10 = vpop.eup %1622  ;;  %v882_v38 = vadd.f32 1.0, %v1621_v9 }
 0x553   :  { %v889_v39 = vadd.f32 1.0, %v1623_v10 }
 0x554   :  { %1624 = vrcp.f32 %v882_v38 }
 0x555   :  { %1626 = vrcp.f32 %v889_v39 }
 0x55e   :  { %v1625_v42 = vpop.eup %1624 }
 0x55f   :  { %v1627_v40 = vpop.eup %1626  ;;  %v893_v44 = vmul.f32 %v1625_v42, %v892_v41 }
 0x560   :  { %v901_v49 = vmul.f32 %v1627_v40, %v899_v47  ;;  %v896_v46 = vsub.f32 1.0, %v1627_v40 }
 0x561   :  { %v894_v37 = vadd.f32 %v893_v44, %v1929_v52 }
 0x563   :  { %1628 = vtanh.f32 %v894_v37 }
 0x56d   :  { %v1629_v48 = vpop.eup %1628 }
 0x56e   :  { %v897_v45 = vmul.f32 %v1629_v48, %v896_v46 }
 0x570   :  { %v902_v51 = vadd.f32 %v901_v49, %v897_v45 }
 0x572   :  { %vm903_vm6 = vcmp.ge.f32.partialorder %v902_v51, 0.0 }
 0x573   :  { %v2126_v43 = vsel %vm903_vm6, 1.0, %v1766_v11 }
 0x574   :  { %v905_v53 = vpack.c.bf16 %v2126_v43, %v2126_v43  ;;  %v1017_v47 = vrot.slane %v2126_v43, 6 }
 0x576   :  { %939 = vmatmul.mubr.bf16.vlgmr.msra.gmra.mrb[20].mxu0 %v905_v53  ;;  %1483 = vmatmul.mubr.bf16.vlgmr.msra.gmra.mrb[20].mxu1 %v905_v53 }
 0x577   :  { %1028 = vmatpush1.bf16.msra.mxu0 %v1839_v13  ;;  %1487 = vmatpush3.bf16.msra.mxu1 %v1841_v14 }
 0x578   :  { %1029 = vmatprep.subr.bf16.mxu0 %v1846_v15  ;;  %1488 = vmatprep.subr.bf16.mxu1 %v1763_v0 }
 0x579   :  { %1059 = vmatprep.mubr.bf16.mxu0 %v1764_v31  ;;  %1502 = vmatprep.mubr.msk.bf16.mxu1 %vm1765_vm1, %v1763_v0 }
 0x57b   :  { %1030 = vmatpush1.bf16.msra.mxu0 %v1849_v16  ;;  %1489 = vmatpush3.bf16.msra.mxu1 %v1851_v17 }
 0x57c   :  { %1031 = vmatprep.subr.bf16.mxu0 %v1856_v18  ;;  %1490 = vmatprep.subr.bf16.mxu1 %v1763_v0 }
 0x57f   :  { %1032 = vmatpush1.bf16.msra.mxu0 %v1859_v19  ;;  %1491 = vmatpush3.bf16.msra.mxu1 %v1861_v20 }
 0x580   :  { %1033 = vmatprep.subr.bf16.mxu0 %v1866_v21  ;;  %1492 = vmatprep.subr.bf16.mxu1 %v1763_v0 }
 0x583   :  { %1034 = vmatpush1.bf16.msra.mxu0 %v1869_v22  ;;  %1493 = vmatpush3.bf16.msra.mxu1 %v1871_v23 }
 0x584   :  { %1035 = vmatprep.subr.bf16.mxu0 %v1876_v24  ;;  %1494 = vmatprep.subr.bf16.mxu1 %v1763_v0 }
 0x587   :  { %1036 = vmatpush1.bf16.msra.mxu0 %v1879_v25  ;;  %1495 = vmatpush3.bf16.msra.mxu1 %v1881_v26 }
 0x588   :  { %1037 = vmatprep.subr.bf16.mxu0 %v1883_v27  ;;  %1496 = vmatprep.subr.bf16.mxu1 %v1763_v0 }
 0x58b   :  { %1038 = vmatpush1.bf16.msra.mxu0 %v1888_v28  ;;  %1497 = vmatpush3.bf16.msra.mxu1 %v1890_v29 }
 0x58c   :  { %1039 = vmatprep.subr.bf16.mxu0 %v1894_v30  ;;  %1498 = vmatprep.subr.bf16.mxu1 %v1763_v0 }
 0x58f   :  { %1040 = vmatpush1.bf16.msra.mxu0 %v1901_v32  ;;  %1499 = vmatpush3.bf16.msra.mxu1 %v1903_v33 }
 0x590   :  { %1041 = vmatprep.subr.bf16.mxu0 %v1907_v34  ;;  %1500 = vmatprep.subr.bf16.mxu1 %v1763_v0 }
 0x593   :  { %1042 = vmatpush1.bf16.msra.mxu0 %v1911_v35  ;;  %1501 = vmatpush3.bf16.msra.mxu1 %v1913_v36 }
 0x594   :  { %1148 = vmatprep.subr.bf16.mxu0 %v1837_v12  ;;  %1506 = vmatprep.subr.bf16.mxu1 %v1763_v0 }
 0x649   :  { %v940_v54 = vpop.f32.mrb[20].mxu0  ;;  %v981_v55 = vpop.f32.mrb[20].mxu1 }
 0x64a   :  { %v988_v3 = vrot.slane %v940_v54, 6  ;;  %v942_v50 = vpop.f32.mrb[21].mxu0  ;;  %v1484_v57 = vpop.f32.mrb[21].mxu1  ;;  %v1007_v39 = vadd.f32 %v1939_v2, %v981_v55 }
 0x64b   :  { %v998_v58 = vrot.slane %v942_v50, 6  ;;  %v944_v60 = vpop.f32.mrb[22].mxu0  ;;  %v984_v61 = vpop.f32.mrb[22].mxu1 }
 0x64c   :  { %v990_v62 = vadd.f32 %v988_v3, %v1931_v56  ;;  %v945_v63 = vpop.f32.mrb[23].mxu0  ;;  %v1485_v1 = vpop.f32.mrb[23].mxu1  ;;  %v1009_v41 = vrot.slane %v1007_v39, 6 }
 0x64d   :  { %v1000_v4 = vadd.f32 %v998_v58, %v1934_v59 }
 0x64e   :  { %v991_v5 = vsub.f32 0.0, %v990_v62 }
 0x64f   :  { %v1001_v6 = vsub.f32 0.0, %v1000_v4 }
 0x650   :  { %v992_v7 = vmul.f32 1.442695, %v991_v5 }
 0x651   :  { %v1002_v12 = vmul.f32 1.442695, %v1001_v6 }
 0x652   :  { %1630 = vpow2.f32 %v992_v7 }
 0x653   :  { %1632 = vpow2.f32 %v1002_v12 }
 0x65c   :  { %v1631_v8 = vpop.eup %1630 }
 0x65d   :  { %v1633_v9 = vpop.eup %1632  ;;  %v994_v10 = vadd.f32 1.0, %v1631_v8 }
 0x65e   :  { %v1004_v38 = vadd.f32 1.0, %v1633_v9 }
 0x65f   :  { %1634 = vrcp.f32 %v994_v10 }
 0x660   :  { %1636 = vrcp.f32 %v1004_v38 }
 0x669   :  { %v1635_v42 = vpop.eup %1634 }
 0x66a   :  { %v1637_v40 = vpop.eup %1636  ;;  %v1011_v44 = vmul.f32 %v1635_v42, %v1009_v41 }
 0x66b   :  { %v1019_v49 = vmul.f32 %v1637_v40, %v1017_v47  ;;  %v1014_v46 = vsub.f32 1.0, %v1637_v40 }
 0x66c   :  { %v1012_v37 = vadd.f32 %v1011_v44, %v1929_v52 }
 0x66e   :  { %1638 = vtanh.f32 %v1012_v37 }
 0x678   :  { %v1639_v48 = vpop.eup %1638 }
 0x679   :  { %v1015_v45 = vmul.f32 %v1639_v48, %v1014_v46 }
 0x67b   :  { %v1020_v51 = vadd.f32 %v1019_v49, %v1015_v45 }
 0x67d   :  { %vm1021_vm7 = vcmp.ge.f32.partialorder %v1020_v51, 0.0 }
 0x67e   :  { %v2171_v53 = vsel %vm1021_vm7, 1.0, %v1766_v11 }
 0x67f   :  { %v1023_v54 = vpack.c.bf16 %v2171_v53, %v2171_v53 }
 0x681   :  { %v1025_v55 = vrot.slane %v1023_v54, 1 }
 0x683   :  { %1060 = vmatmul.mubr.bf16.vlgmr.msra.gmra.mrb[24].mxu0 %v1025_v55  ;;  %1503 = vmatmul.mubr.bf16.vlgmr.msra.gmra.mrb[24].mxu1 %v1025_v55 }
 0x684   :  { %1149 = vmatpush1.bf16.msra.mxu0 %v1839_v13  ;;  %1507 = vmatpush3.bf16.msra.mxu1 %v1841_v14 }
 0x685   :  { %1150 = vmatprep.subr.bf16.mxu0 %v1846_v15  ;;  %1508 = vmatprep.subr.bf16.mxu1 %v1763_v0 }
 0x686   :  { %1180 = vmatprep.mubr.bf16.mxu0 %v1764_v31  ;;  %1522 = vmatprep.mubr.msk.bf16.mxu1 %vm1765_vm1, %v1763_v0 }
 0x688   :  { %1151 = vmatpush1.bf16.msra.mxu0 %v1849_v16  ;;  %1509 = vmatpush3.bf16.msra.mxu1 %v1851_v17 }
 0x689   :  { %1152 = vmatprep.subr.bf16.mxu0 %v1856_v18  ;;  %1510 = vmatprep.subr.bf16.mxu1 %v1763_v0 }
 0x68c   :  { %1153 = vmatpush1.bf16.msra.mxu0 %v1859_v19  ;;  %1511 = vmatpush3.bf16.msra.mxu1 %v1861_v20 }
 0x68d   :  { %1154 = vmatprep.subr.bf16.mxu0 %v1866_v21  ;;  %1512 = vmatprep.subr.bf16.mxu1 %v1763_v0 }
 0x690   :  { %1155 = vmatpush1.bf16.msra.mxu0 %v1869_v22  ;;  %1513 = vmatpush3.bf16.msra.mxu1 %v1871_v23 }
 0x691   :  { %1156 = vmatprep.subr.bf16.mxu0 %v1876_v24  ;;  %1514 = vmatprep.subr.bf16.mxu1 %v1763_v0 }
 0x694   :  { %1157 = vmatpush1.bf16.msra.mxu0 %v1879_v25  ;;  %1515 = vmatpush3.bf16.msra.mxu1 %v1881_v26 }
 0x695   :  { %1158 = vmatprep.subr.bf16.mxu0 %v1883_v27  ;;  %1516 = vmatprep.subr.bf16.mxu1 %v1763_v0 }
 0x698   :  { %1159 = vmatpush1.bf16.msra.mxu0 %v1888_v28  ;;  %1517 = vmatpush3.bf16.msra.mxu1 %v1890_v29 }
 0x699   :  { %1160 = vmatprep.subr.bf16.mxu0 %v1894_v30  ;;  %1518 = vmatprep.subr.bf16.mxu1 %v1763_v0 }
 0x69c   :  { %1161 = vmatpush1.bf16.msra.mxu0 %v1901_v32  ;;  %1519 = vmatpush3.bf16.msra.mxu1 %v1903_v33 }
 0x69d   :  { %1162 = vmatprep.subr.bf16.mxu0 %v1907_v34  ;;  %1520 = vmatprep.subr.bf16.mxu1 %v1763_v0 }
 0x6a0   :  { %1163 = vmatpush1.bf16.msra.mxu0 %v1911_v35  ;;  %1521 = vmatpush3.bf16.msra.mxu1 %v1913_v36  ;;  %v1138_v35 = vrot.slane %v2171_v53, 6 }
 0x756   :  { %v1061_v13 = vpop.f32.mrb[24].mxu0  ;;  %v1102_v14 = vpop.f32.mrb[24].mxu1 }
 0x757   :  { %v1109_v15 = vrot.slane %v1061_v13, 4  ;;  %v1063_v16 = vpop.f32.mrb[25].mxu0  ;;  %v1504_v17 = vpop.f32.mrb[25].mxu1  ;;  %v1128_v32 = vadd.f32 %v1939_v2, %v1102_v14 }
 0x758   :  { %v1119_v18 = vrot.slane %v1063_v16, 4  ;;  %v1065_v19 = vpop.f32.mrb[26].mxu0  ;;  %v1105_v20 = vpop.f32.mrb[26].mxu1 }
 0x759   :  { %v1111_v21 = vadd.f32 %v1109_v15, %v1931_v56  ;;  %v1066_v22 = vpop.f32.mrb[27].mxu0  ;;  %v1505_v23 = vpop.f32.mrb[27].mxu1  ;;  %v1130_v33 = vrot.slane %v1128_v32, 4 }
 0x75a   :  { %v1121_v24 = vadd.f32 %v1119_v18, %v1934_v59 }
 0x75b   :  { %v1112_v25 = vsub.f32 0.0, %v1111_v21 }
 0x75c   :  { %v1122_v0 = vsub.f32 0.0, %v1121_v24 }
 0x75d   :  { %v1113_v26 = vmul.f32 1.442695, %v1112_v25 }
 0x75e   :  { %v1123_v27 = vmul.f32 1.442695, %v1122_v0 }
 0x75f   :  { %1640 = vpow2.f32 %v1113_v26 }
 0x760   :  { %1642 = vpow2.f32 %v1123_v27 }
 0x769   :  { %v1641_v28 = vpop.eup %1640 }
 0x76a   :  { %v1643_v29 = vpop.eup %1642  ;;  %v1115_v30 = vadd.f32 1.0, %v1641_v28 }
 0x76b   :  { %v1125_v31 = vadd.f32 1.0, %v1643_v29 }
 0x76c   :  { %1644 = vrcp.f32 %v1115_v30 }
 0x76d   :  { %1646 = vrcp.f32 %v1125_v31 }
 0x776   :  { %v1645_v34 = vpop.eup %1644 }
 0x777   :  { %v1647_v36 = vpop.eup %1646  ;;  %v1132_v43 = vmul.f32 %v1645_v34, %v1130_v33 }
 0x778   :  { %v1140_v3 = vmul.f32 %v1647_v36, %v1138_v35  ;;  %v1135_v57 = vsub.f32 1.0, %v1647_v36 }
 0x779   :  { %v1133_v50 = vadd.f32 %v1132_v43, %v1929_v52 }
 0x77b   :  { %1648 = vtanh.f32 %v1133_v50 }
 0x785   :  { %v1649_v58 = vpop.eup %1648 }
 0x786   :  { %v1136_v60 = vmul.f32 %v1649_v58, %v1135_v57 }
 0x788   :  { %v1141_v61 = vadd.f32 %v1140_v3, %v1136_v60 }
 0x78a   :  { %vm1142_vm8 = vcmp.ge.f32.partialorder %v1141_v61, 0.0 }
 0x78b   :  { %v1143_v62 = vsel %vm1142_vm8, 1.0, %v1766_v11 }
 0x78c   :  { %v1144_v63 = vpack.c.bf16 %v1143_v62, %v1143_v62  ;;  %v1259_v54 = vrot.slane %v1143_v62, 6 }
 0x78e   :  { %v1146_v1 = vrot.slane %v1144_v63, 2 }
 0x790   :  { %1181 = vmatmul.mubr.bf16.vlgmr.msra.gmra.mrb[28].mxu0 %v1146_v1  ;;  %1523 = vmatmul.mubr.bf16.vlgmr.msra.gmra.mrb[28].mxu1 %v1146_v1 }
 0x863   :  { %v1182_v4 = vpop.f32.mrb[28].mxu0  ;;  %v1223_v5 = vpop.f32.mrb[28].mxu1 }
 0x864   :  { %v1230_v6 = vrot.slane %v1182_v4, 2  ;;  %v1184_v7 = vpop.f32.mrb[29].mxu0  ;;  %v1524_v12 = vpop.f32.mrb[29].mxu1  ;;  %v1249_v51 = vadd.f32 %v1939_v2, %v1223_v5 }
 0x865   :  { %v1240_v8 = vrot.slane %v1184_v7, 2  ;;  %v1186_v9 = vpop.f32.mrb[30].mxu0  ;;  %v1226_v10 = vpop.f32.mrb[30].mxu1 }
 0x866   :  { %v1232_v38 = vadd.f32 %v1230_v6, %v1931_v56  ;;  %v1187_v39 = vpop.f32.mrb[31].mxu0  ;;  %v1525_v41 = vpop.f32.mrb[31].mxu1  ;;  %v1251_v53 = vrot.slane %v1249_v51, 2 }
 0x867   :  { %v1242_v42 = vadd.f32 %v1240_v8, %v1934_v59 }
 0x868   :  { %v1233_v47 = vsub.f32 0.0, %v1232_v38 }
 0x869   :  { %v1243_v40 = vsub.f32 0.0, %v1242_v42 }
 0x86a   :  { %v1234_v44 = vmul.f32 1.442695, %v1233_v47 }
 0x86b   :  { %v1244_v49 = vmul.f32 1.442695, %v1243_v40 }
 0x86c   :  { %1650 = vpow2.f32 %v1234_v44 }
 0x86d   :  { %1652 = vpow2.f32 %v1244_v49 }
 0x876   :  { %v1651_v37 = vpop.eup %1650 }
 0x877   :  { %v1653_v46 = vpop.eup %1652  ;;  %v1236_v48 = vadd.f32 1.0, %v1651_v37 }
 0x878   :  { %v1246_v45 = vadd.f32 1.0, %v1653_v46 }
 0x879   :  { %1654 = vrcp.f32 %v1236_v48 }
 0x87a   :  { %1656 = vrcp.f32 %v1246_v45 }
 0x883   :  { %v1655_v56 = vpop.eup %1654 }
 0x884   :  { %v1657_v55 = vpop.eup %1656  ;;  %v1253_v13 = vmul.f32 %v1655_v56, %v1251_v53 }
 0x885   :  { %v1261_v59 = vmul.f32 %v1657_v55, %v1259_v54  ;;  %v1256_v15 = vsub.f32 1.0, %v1657_v55 }
 0x886   :  { %v1254_v14 = vadd.f32 %v1253_v13, %v1929_v52 }
 0x888   :  { %1658 = vtanh.f32 %v1254_v14 }
 0x892   :  { %v1659_v16 = vpop.eup %1658 }
 0x893   :  { %v1257_v17 = vmul.f32 %v1659_v16, %v1256_v15 }
 0x895   :  { %v1262_v18 = vadd.f32 %v1261_v59, %v1257_v17 }
 0x897   :  { %vm1263_vm10 = vcmp.ge.f32.partialorder %v1262_v18, 0.0 }
 0x898   :  { %v1264_v2 = vsel %vm1263_vm10, 1.0, %v1766_v11 }
 0x899   :  { %1266 = vst.msk [vmem:[#allocation8 - $0x6] sm:$0xc0] %vm1265_vm9, %v1264_v2 }
 0x89a   :  { %1737 = shalt.err (!%p1734_p0)
}
 0x89b   :  { %s1738_s14 = scalar_lea.hbm %s2236_s5, 32 }
 0x89c   :  { %p1739_p1 = scmp.ne.s32.totalorder %s2236_s5, %s1738_s14  ;;  %p1742_p2 = scmp.lt.u32.totalorder %s1738_s14, %s2236_s5 }
 0x89e   :  { %p1744_p3 = pnand %p1742_p2, %p1739_p1 }
 0x8a0   :  { %1747 = shalt.err (!%p1744_p3)
}
 0x8a1   :  { %1276 = dma.vmem_to_hbm [thread:$0]  %s1274_s10, 32, %s2236_s5, [#allocation4]  }
 0x8a2   :  { %1752 = dma.done.wait [#allocation4], 32  }
 0x8a3   :  { %1753 = vsyncadd [#allocation4], 4294967264 }
 0x8a4   :  { %1280 = vsyncpa [#allocation3], 1 }
 0x8a5   :  { %1281 = vsyncpa [#allocation6], 1 }
 0x8a6   :  { %1282 = vsyncpa [#allocation4], 1 }

</bundles_post_ra>
